<compile_context>
chip_gen: v6e
topology: v6e:2x2x1
jax: 0.10.0
libtpu: 0.0.40
codegen_flags: <defaults>
</compile_context>

<pallas_src>
import jax
import jax.numpy as jnp
from jax.experimental import pallas as pl
from jax.experimental.pallas import tpu as pltpu


def _round_up(x, m):
    return (x + m - 1) // m * m


def _trigram_kernel(idx_ref, emb_hbm, w_ref, b_ref, out_ref, z_ref, sem_ref):
    """One (batch-tile, vocab-tile) grid step.

    idx_ref : (B_pad, 2) int32 in SMEM (scalar prefetch)
    emb_hbm : (V, E_pad) f32 in HBM (manual DMA gather)
    w_ref   : (2*E_pad, tn) f32 VMEM tile of the pre-transposed Linear weight
    b_ref   : (1, tn)       f32 bias tile
    out_ref : (tb, tn)      f32 logits tile
    z_ref   : (tb, 2*E_pad) f32 scratch = concat(emb[i0], emb[i1]) per row
    sem_ref : (tb, 2) DMA semaphores
    """
    E_pad = emb_hbm.shape[1]
    tb = z_ref.shape[0]
    bt = pl.program_id(0)

    # Gather the two context-embedding rows for every batch element of this
    # batch tile, once per batch tile (vocab axis is the innermost grid axis,
    # marked "arbitrary", so v == 0 runs first for every batch tile).
    @pl.when(pl.program_id(1) == 0)
    def _gather():
        base = bt * tb
        copies = []
        for b in range(tb):              # static unroll; tb <= 128
            for c in range(2):           # two context positions
                tok = idx_ref[base + b, c]
                cp = pltpu.make_async_copy(
                    emb_hbm.at[pl.ds(tok, 1), :],                      # (1, E_pad)
                    z_ref.at[pl.ds(b, 1), pl.ds(c * E_pad, E_pad)],    # (1, E_pad)
                    sem_ref.at[b, c],
                )
                cp.start()
                copies.append(cp)
        for cp in copies:
            cp.wait()

    # Single merged MXU matmul (K = 2*E_pad, lane-dense N tile) + bias.
    out_ref[...] = (
        jnp.dot(z_ref[...], w_ref[...], preferred_element_type=jnp.float32)
        + b_ref[...]
    ).astype(out_ref.dtype)


def prepare_trigram_params(emb_table, linear_w, linear_b, *, tn_target=512):
    """One-time layout preparation (do NOT run per forward call):
       pad E and V to multiples of 128 and pre-transpose the Linear weight
       into its (2*E_pad, V_pad) streamed layout."""
    V, E = emb_table.shape
    E_pad = _round_up(E, 128)
    V_pad = _round_up(V, 128)
    tn = min(tn_target, V_pad)
    V_pad = _round_up(V_pad, tn)          # vocab tiling divides exactly

    emb_pad = jnp.zeros((V, E_pad), jnp.float32).at[:, :E].set(
        emb_table.astype(jnp.float32))

    # w_prep rows [0:E)           <- W[:, 0:E].T   (context position 0)
    # w_prep rows [E_pad:E_pad+E) <- W[:, E:2E].T  (context position 1)
    w_prep = jnp.zeros((2 * E_pad, V_pad), jnp.float32)
    w_prep = w_prep.at[0:E, 0:V].set(linear_w[:, 0:E].T.astype(jnp.float32))
    w_prep = w_prep.at[E_pad:E_pad + E, 0:V].set(
        linear_w[:, E:2 * E].T.astype(jnp.float32))

    b_prep = jnp.zeros((1, V_pad), jnp.float32).at[0, 0:V].set(
        linear_b.astype(jnp.float32))
    return emb_pad, w_prep, b_prep


def trigram_lm_forward(inputs, emb_pad, w_prep, b_prep):
    """inputs: (B, 2) int token ids; params from prepare_trigram_params()."""
    B = inputs.shape[0]
    V, E_pad = emb_pad.shape
    twoE_pad, V_pad = w_prep.shape

    tn = min(512, V_pad)                              # 512 fits v7x 64 MiB VMEM
    tb = 128 if B >= 128 else _round_up(B, 8)         # MXU-row-sized batch tile
    B_pad = _round_up(B, tb)

    # Padded rows use token 0 (valid index); their logits are trimmed below.
    idx = jnp.zeros((B_pad, 2), jnp.int32).at[:B, :].set(inputs.astype(jnp.int32))

    grid = (B_pad // tb, V_pad // tn)
    grid_spec = pltpu.PrefetchScalarGridSpec(
        num_scalar_prefetch=1,                        # idx -> SMEM
        grid=grid,
        in_specs=[
            pl.BlockSpec(memory_space=pl.ANY),                        # emb table (HBM)
            pl.BlockSpec((twoE_pad, tn), lambda b, v, idx: (0, v)),   # weight tile
            pl.BlockSpec((1, tn), lambda b, v, idx: (0, v)),          # bias tile
        ],
        out_specs=pl.BlockSpec((tb, tn), lambda b, v, idx: (b, v)),
        scratch_shapes=[
            pltpu.VMEM((tb, twoE_pad), jnp.float32),  # concat(e0, e1) per row
            pltpu.SemaphoreType.DMA((tb, 2)),
        ],
    )

    out = pl.pallas_call(
        _trigram_kernel,
        out_shape=jax.ShapeDtypeStruct((B_pad, V_pad), jnp.float32),
        grid_spec=grid_spec,
        compiler_params=pltpu.CompilerParams(
            dimension_semantics=("parallel", "arbitrary")),
    )(idx, emb_pad, w_prep, b_prep)

    return out[:B, :V]


def trigram_lm_reference(inputs, emb_table, linear_w, linear_b):
    Z = emb_table[inputs]                 # (B, 2, E)
    z1 = Z.reshape(Z.shape[0], -1)        # (B, 2E)
    return z1 @ linear_w.T + linear_b     # (B, V)


if __name__ == "__main__":
    # Small, deterministic setup consistent with TrigramLM(vocab_size, embedding_dim=10).
    vocab_size = 32
    embedding_dim = 10
    batch = 8

    key = jax.random.PRNGKey(0)
    k_emb, k_w, k_b, k_idx = jax.random.split(key, 4)

    emb_table = jax.random.normal(k_emb, (vocab_size, embedding_dim), jnp.float32)
    bound = 1.0 / jnp.sqrt(2.0 * embedding_dim)
    linear_w = jax.random.uniform(k_w, (vocab_size, 2 * embedding_dim),
                                  jnp.float32, -bound, bound)
    linear_b = jax.random.uniform(k_b, (vocab_size,), jnp.float32, -bound, bound)

    inputs = jax.random.randint(k_idx, (batch, 2), 0, vocab_size, jnp.int32)

    # Layout prep once (pad + transpose), then the per-call kernel path.
    emb_pad, w_prep, b_prep = prepare_trigram_params(emb_table, linear_w, linear_b)
    out = trigram_lm_forward(inputs, emb_pad, w_prep, b_prep)
    out = jax.block_until_ready(out)

    ref = trigram_lm_reference(inputs, emb_table, linear_w, linear_b)
    assert out.shape == (batch, vocab_size)
    assert jnp.allclose(out, ref, atol=1e-5, rtol=1e-5), "mismatch vs reference"

    print("KERNEL_OK")
</pallas_src>

<mosaic_0001>
module attributes {stable_mosaic.version = 11 : i64} {
  func.func @_trigram_kernel(%arg0: i32, %arg1: i32, %arg2: memref<8x2xi32, #tpu.memory_space<smem>>, %arg3: memref<32x128xf32, #tpu.memory_space<any>>, %arg4: memref<256x128xf32, #tpu.memory_space<vmem>>, %arg5: memref<1x128xf32, #tpu.memory_space<vmem>>, %arg6: memref<8x128xf32, #tpu.memory_space<vmem>>, %arg7: memref<8x256xf32, #tpu.memory_space<vmem>>, %arg8: memref<8x2x!tpu.dma_semaphore, #tpu.memory_space<semaphore_mem>>) attributes {dimension_semantics = [#tpu.dimension_semantics<parallel>, #tpu.dimension_semantics<arbitrary>], iteration_bounds = array<i64: 1, 1>, scalar_prefetch = 1 : i64, scratch_operands = 2 : i64, tpu.core_type = #tpu.core_type<tc>, window_params = [{}, {transform_indices = @transform_1, window_bounds = array<i64: 256, 128>}, {transform_indices = @transform_2, window_bounds = array<i64: 1, 128>}, {transform_indices = @transform_3, window_bounds = array<i64: 8, 128>}]} {
    %c0_i32 = arith.constant 0 : i32
    %0 = arith.cmpi eq, %arg1, %c0_i32 : i32
    %1 = arith.extui %0 : i1 to i32
    %c0_i32_0 = arith.constant 0 : i32
    %2 = arith.cmpi ne, %1, %c0_i32_0 : i32
    scf.if %2 {
      %c8_i32 = arith.constant 8 : i32
      %10 = arith.muli %arg0, %c8_i32 : i32
      %c0_i32_8 = arith.constant 0 : i32
      %11 = arith.addi %10, %c0_i32_8 : i32
      %12 = arith.index_cast %11 : i32 to index
      %c0_9 = arith.constant 0 : index
      %13 = memref.load %arg2[%12, %c0_9] : memref<8x2xi32, #tpu.memory_space<smem>>
      %c0_i32_10 = arith.constant 0 : i32
      %c0_i32_11 = arith.constant 0 : i32
      %c0_i32_12 = arith.constant 0 : i32
      %14 = tpu.memref_slice %arg3[%13, %c0_i32_12] : memref<32x128xf32, #tpu.memory_space<any>> -> memref<1x128xf32, #tpu.memory_space<any>>
      %c0_i32_13 = arith.constant 0 : i32
      %c0_i32_14 = arith.constant 0 : i32
      %15 = tpu.memref_slice %arg7[%c0_i32_13, %c0_i32_14] : memref<8x256xf32, #tpu.memory_space<vmem>> -> memref<1x128xf32, #tpu.memory_space<vmem>>
      %16 = tpu.memref_slice %arg8[%c0_i32_10, %c0_i32_11] : memref<8x2x!tpu.dma_semaphore, #tpu.memory_space<semaphore_mem>> -> memref<1x1x!tpu.dma_semaphore, #tpu.memory_space<semaphore_mem>>
      %17 = tpu.memref_squeeze %16 : memref<1x1x!tpu.dma_semaphore, #tpu.memory_space<semaphore_mem>> -> memref<!tpu.dma_semaphore, #tpu.memory_space<semaphore_mem>>
      tpu.enqueue_dma source(%14 : memref<1x128xf32, #tpu.memory_space<any>>) target(%15 : memref<1x128xf32, #tpu.memory_space<vmem>>) target_semaphore(%17 : memref<!tpu.dma_semaphore, #tpu.memory_space<semaphore_mem>>)
      %c0_i32_15 = arith.constant 0 : i32
      %18 = arith.addi %10, %c0_i32_15 : i32
      %19 = arith.index_cast %18 : i32 to index
      %c1 = arith.constant 1 : index
      %20 = memref.load %arg2[%19, %c1] : memref<8x2xi32, #tpu.memory_space<smem>>
      %c0_i32_16 = arith.constant 0 : i32
      %c1_i32 = arith.constant 1 : i32
      %c0_i32_17 = arith.constant 0 : i32
      %21 = tpu.memref_slice %arg3[%20, %c0_i32_17] : memref<32x128xf32, #tpu.memory_space<any>> -> memref<1x128xf32, #tpu.memory_space<any>>
      %c0_i32_18 = arith.constant 0 : i32
      %c128_i32 = arith.constant 128 : i32
      %22 = tpu.memref_slice %arg7[%c0_i32_18, %c128_i32] : memref<8x256xf32, #tpu.memory_space<vmem>> -> memref<1x128xf32, #tpu.memory_space<vmem>>
      %23 = tpu.memref_slice %arg8[%c0_i32_16, %c1_i32] : memref<8x2x!tpu.dma_semaphore, #tpu.memory_space<semaphore_mem>> -> memref<1x1x!tpu.dma_semaphore, #tpu.memory_space<semaphore_mem>>
      %24 = tpu.memref_squeeze %23 : memref<1x1x!tpu.dma_semaphore, #tpu.memory_space<semaphore_mem>> -> memref<!tpu.dma_semaphore, #tpu.memory_space<semaphore_mem>>
      tpu.enqueue_dma source(%21 : memref<1x128xf32, #tpu.memory_space<any>>) target(%22 : memref<1x128xf32, #tpu.memory_space<vmem>>) target_semaphore(%24 : memref<!tpu.dma_semaphore, #tpu.memory_space<semaphore_mem>>)
      %c1_i32_19 = arith.constant 1 : i32
      %25 = arith.addi %10, %c1_i32_19 : i32
      %26 = arith.index_cast %25 : i32 to index
      %c0_20 = arith.constant 0 : index
      %27 = memref.load %arg2[%26, %c0_20] : memref<8x2xi32, #tpu.memory_space<smem>>
      %c1_i32_21 = arith.constant 1 : i32
      %c0_i32_22 = arith.constant 0 : i32
      %c0_i32_23 = arith.constant 0 : i32
      %28 = tpu.memref_slice %arg3[%27, %c0_i32_23] : memref<32x128xf32, #tpu.memory_space<any>> -> memref<1x128xf32, #tpu.memory_space<any>>
      %c1_i32_24 = arith.constant 1 : i32
      %c0_i32_25 = arith.constant 0 : i32
      %29 = tpu.memref_slice %arg7[%c1_i32_24, %c0_i32_25] : memref<8x256xf32, #tpu.memory_space<vmem>> -> memref<1x128xf32, #tpu.memory_space<vmem>>
      %30 = tpu.memref_slice %arg8[%c1_i32_21, %c0_i32_22] : memref<8x2x!tpu.dma_semaphore, #tpu.memory_space<semaphore_mem>> -> memref<1x1x!tpu.dma_semaphore, #tpu.memory_space<semaphore_mem>>
      %31 = tpu.memref_squeeze %30 : memref<1x1x!tpu.dma_semaphore, #tpu.memory_space<semaphore_mem>> -> memref<!tpu.dma_semaphore, #tpu.memory_space<semaphore_mem>>
      tpu.enqueue_dma source(%28 : memref<1x128xf32, #tpu.memory_space<any>>) target(%29 : memref<1x128xf32, #tpu.memory_space<vmem>>) target_semaphore(%31 : memref<!tpu.dma_semaphore, #tpu.memory_space<semaphore_mem>>)
      %c1_i32_26 = arith.constant 1 : i32
      %32 = arith.addi %10, %c1_i32_26 : i32
      %33 = arith.index_cast %32 : i32 to index
      %c1_27 = arith.constant 1 : index
      %34 = memref.load %arg2[%33, %c1_27] : memref<8x2xi32, #tpu.memory_space<smem>>
      %c1_i32_28 = arith.constant 1 : i32
      %c1_i32_29 = arith.constant 1 : i32
      %c0_i32_30 = arith.constant 0 : i32
      %35 = tpu.memref_slice %arg3[%34, %c0_i32_30] : memref<32x128xf32, #tpu.memory_space<any>> -> memref<1x128xf32, #tpu.memory_space<any>>
      %c1_i32_31 = arith.constant 1 : i32
      %c128_i32_32 = arith.constant 128 : i32
      %36 = tpu.memref_slice %arg7[%c1_i32_31, %c128_i32_32] : memref<8x256xf32, #tpu.memory_space<vmem>> -> memref<1x128xf32, #tpu.memory_space<vmem>>
      %37 = tpu.memref_slice %arg8[%c1_i32_28, %c1_i32_29] : memref<8x2x!tpu.dma_semaphore, #tpu.memory_space<semaphore_mem>> -> memref<1x1x!tpu.dma_semaphore, #tpu.memory_space<semaphore_mem>>
      %38 = tpu.memref_squeeze %37 : memref<1x1x!tpu.dma_semaphore, #tpu.memory_space<semaphore_mem>> -> memref<!tpu.dma_semaphore, #tpu.memory_space<semaphore_mem>>
      tpu.enqueue_dma source(%35 : memref<1x128xf32, #tpu.memory_space<any>>) target(%36 : memref<1x128xf32, #tpu.memory_space<vmem>>) target_semaphore(%38 : memref<!tpu.dma_semaphore, #tpu.memory_space<semaphore_mem>>)
      %c2_i32 = arith.constant 2 : i32
      %39 = arith.addi %10, %c2_i32 : i32
      %40 = arith.index_cast %39 : i32 to index
      %c0_33 = arith.constant 0 : index
      %41 = memref.load %arg2[%40, %c0_33] : memref<8x2xi32, #tpu.memory_space<smem>>
      %c2_i32_34 = arith.constant 2 : i32
      %c0_i32_35 = arith.constant 0 : i32
      %c0_i32_36 = arith.constant 0 : i32
      %42 = tpu.memref_slice %arg3[%41, %c0_i32_36] : memref<32x128xf32, #tpu.memory_space<any>> -> memref<1x128xf32, #tpu.memory_space<any>>
      %c2_i32_37 = arith.constant 2 : i32
      %c0_i32_38 = arith.constant 0 : i32
      %43 = tpu.memref_slice %arg7[%c2_i32_37, %c0_i32_38] : memref<8x256xf32, #tpu.memory_space<vmem>> -> memref<1x128xf32, #tpu.memory_space<vmem>>
      %44 = tpu.memref_slice %arg8[%c2_i32_34, %c0_i32_35] : memref<8x2x!tpu.dma_semaphore, #tpu.memory_space<semaphore_mem>> -> memref<1x1x!tpu.dma_semaphore, #tpu.memory_space<semaphore_mem>>
      %45 = tpu.memref_squeeze %44 : memref<1x1x!tpu.dma_semaphore, #tpu.memory_space<semaphore_mem>> -> memref<!tpu.dma_semaphore, #tpu.memory_space<semaphore_mem>>
      tpu.enqueue_dma source(%42 : memref<1x128xf32, #tpu.memory_space<any>>) target(%43 : memref<1x128xf32, #tpu.memory_space<vmem>>) target_semaphore(%45 : memref<!tpu.dma_semaphore, #tpu.memory_space<semaphore_mem>>)
      %c2_i32_39 = arith.constant 2 : i32
      %46 = arith.addi %10, %c2_i32_39 : i32
      %47 = arith.index_cast %46 : i32 to index
      %c1_40 = arith.constant 1 : index
      %48 = memref.load %arg2[%47, %c1_40] : memref<8x2xi32, #tpu.memory_space<smem>>
      %c2_i32_41 = arith.constant 2 : i32
      %c1_i32_42 = arith.constant 1 : i32
      %c0_i32_43 = arith.constant 0 : i32
      %49 = tpu.memref_slice %arg3[%48, %c0_i32_43] : memref<32x128xf32, #tpu.memory_space<any>> -> memref<1x128xf32, #tpu.memory_space<any>>
      %c2_i32_44 = arith.constant 2 : i32
      %c128_i32_45 = arith.constant 128 : i32
      %50 = tpu.memref_slice %arg7[%c2_i32_44, %c128_i32_45] : memref<8x256xf32, #tpu.memory_space<vmem>> -> memref<1x128xf32, #tpu.memory_space<vmem>>
      %51 = tpu.memref_slice %arg8[%c2_i32_41, %c1_i32_42] : memref<8x2x!tpu.dma_semaphore, #tpu.memory_space<semaphore_mem>> -> memref<1x1x!tpu.dma_semaphore, #tpu.memory_space<semaphore_mem>>
      %52 = tpu.memref_squeeze %51 : memref<1x1x!tpu.dma_semaphore, #tpu.memory_space<semaphore_mem>> -> memref<!tpu.dma_semaphore, #tpu.memory_space<semaphore_mem>>
      tpu.enqueue_dma source(%49 : memref<1x128xf32, #tpu.memory_space<any>>) target(%50 : memref<1x128xf32, #tpu.memory_space<vmem>>) target_semaphore(%52 : memref<!tpu.dma_semaphore, #tpu.memory_space<semaphore_mem>>)
      %c3_i32 = arith.constant 3 : i32
      %53 = arith.addi %10, %c3_i32 : i32
      %54 = arith.index_cast %53 : i32 to index
      %c0_46 = arith.constant 0 : index
      %55 = memref.load %arg2[%54, %c0_46] : memref<8x2xi32, #tpu.memory_space<smem>>
      %c3_i32_47 = arith.constant 3 : i32
      %c0_i32_48 = arith.constant 0 : i32
      %c0_i32_49 = arith.constant 0 : i32
      %56 = tpu.memref_slice %arg3[%55, %c0_i32_49] : memref<32x128xf32, #tpu.memory_space<any>> -> memref<1x128xf32, #tpu.memory_space<any>>
      %c3_i32_50 = arith.constant 3 : i32
      %c0_i32_51 = arith.constant 0 : i32
      %57 = tpu.memref_slice %arg7[%c3_i32_50, %c0_i32_51] : memref<8x256xf32, #tpu.memory_space<vmem>> -> memref<1x128xf32, #tpu.memory_space<vmem>>
      %58 = tpu.memref_slice %arg8[%c3_i32_47, %c0_i32_48] : memref<8x2x!tpu.dma_semaphore, #tpu.memory_space<semaphore_mem>> -> memref<1x1x!tpu.dma_semaphore, #tpu.memory_space<semaphore_mem>>
      %59 = tpu.memref_squeeze %58 : memref<1x1x!tpu.dma_semaphore, #tpu.memory_space<semaphore_mem>> -> memref<!tpu.dma_semaphore, #tpu.memory_space<semaphore_mem>>
      tpu.enqueue_dma source(%56 : memref<1x128xf32, #tpu.memory_space<any>>) target(%57 : memref<1x128xf32, #tpu.memory_space<vmem>>) target_semaphore(%59 : memref<!tpu.dma_semaphore, #tpu.memory_space<semaphore_mem>>)
      %c3_i32_52 = arith.constant 3 : i32
      %60 = arith.addi %10, %c3_i32_52 : i32
      %61 = arith.index_cast %60 : i32 to index
      %c1_53 = arith.constant 1 : index
      %62 = memref.load %arg2[%61, %c1_53] : memref<8x2xi32, #tpu.memory_space<smem>>
      %c3_i32_54 = arith.constant 3 : i32
      %c1_i32_55 = arith.constant 1 : i32
      %c0_i32_56 = arith.constant 0 : i32
      %63 = tpu.memref_slice %arg3[%62, %c0_i32_56] : memref<32x128xf32, #tpu.memory_space<any>> -> memref<1x128xf32, #tpu.memory_space<any>>
      %c3_i32_57 = arith.constant 3 : i32
      %c128_i32_58 = arith.constant 128 : i32
      %64 = tpu.memref_slice %arg7[%c3_i32_57, %c128_i32_58] : memref<8x256xf32, #tpu.memory_space<vmem>> -> memref<1x128xf32, #tpu.memory_space<vmem>>
      %65 = tpu.memref_slice %arg8[%c3_i32_54, %c1_i32_55] : memref<8x2x!tpu.dma_semaphore, #tpu.memory_space<semaphore_mem>> -> memref<1x1x!tpu.dma_semaphore, #tpu.memory_space<semaphore_mem>>
      %66 = tpu.memref_squeeze %65 : memref<1x1x!tpu.dma_semaphore, #tpu.memory_space<semaphore_mem>> -> memref<!tpu.dma_semaphore, #tpu.memory_space<semaphore_mem>>
      tpu.enqueue_dma source(%63 : memref<1x128xf32, #tpu.memory_space<any>>) target(%64 : memref<1x128xf32, #tpu.memory_space<vmem>>) target_semaphore(%66 : memref<!tpu.dma_semaphore, #tpu.memory_space<semaphore_mem>>)
      %c4_i32 = arith.constant 4 : i32
      %67 = arith.addi %10, %c4_i32 : i32
      %68 = arith.index_cast %67 : i32 to index
      %c0_59 = arith.constant 0 : index
      %69 = memref.load %arg2[%68, %c0_59] : memref<8x2xi32, #tpu.memory_space<smem>>
      %c4_i32_60 = arith.constant 4 : i32
      %c0_i32_61 = arith.constant 0 : i32
      %c0_i32_62 = arith.constant 0 : i32
      %70 = tpu.memref_slice %arg3[%69, %c0_i32_62] : memref<32x128xf32, #tpu.memory_space<any>> -> memref<1x128xf32, #tpu.memory_space<any>>
      %c4_i32_63 = arith.constant 4 : i32
      %c0_i32_64 = arith.constant 0 : i32
      %71 = tpu.memref_slice %arg7[%c4_i32_63, %c0_i32_64] : memref<8x256xf32, #tpu.memory_space<vmem>> -> memref<1x128xf32, #tpu.memory_space<vmem>>
      %72 = tpu.memref_slice %arg8[%c4_i32_60, %c0_i32_61] : memref<8x2x!tpu.dma_semaphore, #tpu.memory_space<semaphore_mem>> -> memref<1x1x!tpu.dma_semaphore, #tpu.memory_space<semaphore_mem>>
      %73 = tpu.memref_squeeze %72 : memref<1x1x!tpu.dma_semaphore, #tpu.memory_space<semaphore_mem>> -> memref<!tpu.dma_semaphore, #tpu.memory_space<semaphore_mem>>
      tpu.enqueue_dma source(%70 : memref<1x128xf32, #tpu.memory_space<any>>) target(%71 : memref<1x128xf32, #tpu.memory_space<vmem>>) target_semaphore(%73 : memref<!tpu.dma_semaphore, #tpu.memory_space<semaphore_mem>>)
      %c4_i32_65 = arith.constant 4 : i32
      %74 = arith.addi %10, %c4_i32_65 : i32
      %75 = arith.index_cast %74 : i32 to index
      %c1_66 = arith.constant 1 : index
      %76 = memref.load %arg2[%75, %c1_66] : memref<8x2xi32, #tpu.memory_space<smem>>
      %c4_i32_67 = arith.constant 4 : i32
      %c1_i32_68 = arith.constant 1 : i32
      %c0_i32_69 = arith.constant 0 : i32
      %77 = tpu.memref_slice %arg3[%76, %c0_i32_69] : memref<32x128xf32, #tpu.memory_space<any>> -> memref<1x128xf32, #tpu.memory_space<any>>
      %c4_i32_70 = arith.constant 4 : i32
      %c128_i32_71 = arith.constant 128 : i32
      %78 = tpu.memref_slice %arg7[%c4_i32_70, %c128_i32_71] : memref<8x256xf32, #tpu.memory_space<vmem>> -> memref<1x128xf32, #tpu.memory_space<vmem>>
      %79 = tpu.memref_slice %arg8[%c4_i32_67, %c1_i32_68] : memref<8x2x!tpu.dma_semaphore, #tpu.memory_space<semaphore_mem>> -> memref<1x1x!tpu.dma_semaphore, #tpu.memory_space<semaphore_mem>>
      %80 = tpu.memref_squeeze %79 : memref<1x1x!tpu.dma_semaphore, #tpu.memory_space<semaphore_mem>> -> memref<!tpu.dma_semaphore, #tpu.memory_space<semaphore_mem>>
      tpu.enqueue_dma source(%77 : memref<1x128xf32, #tpu.memory_space<any>>) target(%78 : memref<1x128xf32, #tpu.memory_space<vmem>>) target_semaphore(%80 : memref<!tpu.dma_semaphore, #tpu.memory_space<semaphore_mem>>)
      %c5_i32 = arith.constant 5 : i32
      %81 = arith.addi %10, %c5_i32 : i32
      %82 = arith.index_cast %81 : i32 to index
      %c0_72 = arith.constant 0 : index
      %83 = memref.load %arg2[%82, %c0_72] : memref<8x2xi32, #tpu.memory_space<smem>>
      %c5_i32_73 = arith.constant 5 : i32
      %c0_i32_74 = arith.constant 0 : i32
      %c0_i32_75 = arith.constant 0 : i32
      %84 = tpu.memref_slice %arg3[%83, %c0_i32_75] : memref<32x128xf32, #tpu.memory_space<any>> -> memref<1x128xf32, #tpu.memory_space<any>>
      %c5_i32_76 = arith.constant 5 : i32
      %c0_i32_77 = arith.constant 0 : i32
      %85 = tpu.memref_slice %arg7[%c5_i32_76, %c0_i32_77] : memref<8x256xf32, #tpu.memory_space<vmem>> -> memref<1x128xf32, #tpu.memory_space<vmem>>
      %86 = tpu.memref_slice %arg8[%c5_i32_73, %c0_i32_74] : memref<8x2x!tpu.dma_semaphore, #tpu.memory_space<semaphore_mem>> -> memref<1x1x!tpu.dma_semaphore, #tpu.memory_space<semaphore_mem>>
      %87 = tpu.memref_squeeze %86 : memref<1x1x!tpu.dma_semaphore, #tpu.memory_space<semaphore_mem>> -> memref<!tpu.dma_semaphore, #tpu.memory_space<semaphore_mem>>
      tpu.enqueue_dma source(%84 : memref<1x128xf32, #tpu.memory_space<any>>) target(%85 : memref<1x128xf32, #tpu.memory_space<vmem>>) target_semaphore(%87 : memref<!tpu.dma_semaphore, #tpu.memory_space<semaphore_mem>>)
      %c5_i32_78 = arith.constant 5 : i32
      %88 = arith.addi %10, %c5_i32_78 : i32
      %89 = arith.index_cast %88 : i32 to index
      %c1_79 = arith.constant 1 : index
      %90 = memref.load %arg2[%89, %c1_79] : memref<8x2xi32, #tpu.memory_space<smem>>
      %c5_i32_80 = arith.constant 5 : i32
      %c1_i32_81 = arith.constant 1 : i32
      %c0_i32_82 = arith.constant 0 : i32
      %91 = tpu.memref_slice %arg3[%90, %c0_i32_82] : memref<32x128xf32, #tpu.memory_space<any>> -> memref<1x128xf32, #tpu.memory_space<any>>
      %c5_i32_83 = arith.constant 5 : i32
      %c128_i32_84 = arith.constant 128 : i32
      %92 = tpu.memref_slice %arg7[%c5_i32_83, %c128_i32_84] : memref<8x256xf32, #tpu.memory_space<vmem>> -> memref<1x128xf32, #tpu.memory_space<vmem>>
      %93 = tpu.memref_slice %arg8[%c5_i32_80, %c1_i32_81] : memref<8x2x!tpu.dma_semaphore, #tpu.memory_space<semaphore_mem>> -> memref<1x1x!tpu.dma_semaphore, #tpu.memory_space<semaphore_mem>>
      %94 = tpu.memref_squeeze %93 : memref<1x1x!tpu.dma_semaphore, #tpu.memory_space<semaphore_mem>> -> memref<!tpu.dma_semaphore, #tpu.memory_space<semaphore_mem>>
      tpu.enqueue_dma source(%91 : memref<1x128xf32, #tpu.memory_space<any>>) target(%92 : memref<1x128xf32, #tpu.memory_space<vmem>>) target_semaphore(%94 : memref<!tpu.dma_semaphore, #tpu.memory_space<semaphore_mem>>)
      %c6_i32 = arith.constant 6 : i32
      %95 = arith.addi %10, %c6_i32 : i32
      %96 = arith.index_cast %95 : i32 to index
      %c0_85 = arith.constant 0 : index
      %97 = memref.load %arg2[%96, %c0_85] : memref<8x2xi32, #tpu.memory_space<smem>>
      %c6_i32_86 = arith.constant 6 : i32
      %c0_i32_87 = arith.constant 0 : i32
      %c0_i32_88 = arith.constant 0 : i32
      %98 = tpu.memref_slice %arg3[%97, %c0_i32_88] : memref<32x128xf32, #tpu.memory_space<any>> -> memref<1x128xf32, #tpu.memory_space<any>>
      %c6_i32_89 = arith.constant 6 : i32
      %c0_i32_90 = arith.constant 0 : i32
      %99 = tpu.memref_slice %arg7[%c6_i32_89, %c0_i32_90] : memref<8x256xf32, #tpu.memory_space<vmem>> -> memref<1x128xf32, #tpu.memory_space<vmem>>
      %100 = tpu.memref_slice %arg8[%c6_i32_86, %c0_i32_87] : memref<8x2x!tpu.dma_semaphore, #tpu.memory_space<semaphore_mem>> -> memref<1x1x!tpu.dma_semaphore, #tpu.memory_space<semaphore_mem>>
      %101 = tpu.memref_squeeze %100 : memref<1x1x!tpu.dma_semaphore, #tpu.memory_space<semaphore_mem>> -> memref<!tpu.dma_semaphore, #tpu.memory_space<semaphore_mem>>
      tpu.enqueue_dma source(%98 : memref<1x128xf32, #tpu.memory_space<any>>) target(%99 : memref<1x128xf32, #tpu.memory_space<vmem>>) target_semaphore(%101 : memref<!tpu.dma_semaphore, #tpu.memory_space<semaphore_mem>>)
      %c6_i32_91 = arith.constant 6 : i32
      %102 = arith.addi %10, %c6_i32_91 : i32
      %103 = arith.index_cast %102 : i32 to index
      %c1_92 = arith.constant 1 : index
      %104 = memref.load %arg2[%103, %c1_92] : memref<8x2xi32, #tpu.memory_space<smem>>
      %c6_i32_93 = arith.constant 6 : i32
      %c1_i32_94 = arith.constant 1 : i32
      %c0_i32_95 = arith.constant 0 : i32
      %105 = tpu.memref_slice %arg3[%104, %c0_i32_95] : memref<32x128xf32, #tpu.memory_space<any>> -> memref<1x128xf32, #tpu.memory_space<any>>
      %c6_i32_96 = arith.constant 6 : i32
      %c128_i32_97 = arith.constant 128 : i32
      %106 = tpu.memref_slice %arg7[%c6_i32_96, %c128_i32_97] : memref<8x256xf32, #tpu.memory_space<vmem>> -> memref<1x128xf32, #tpu.memory_space<vmem>>
      %107 = tpu.memref_slice %arg8[%c6_i32_93, %c1_i32_94] : memref<8x2x!tpu.dma_semaphore, #tpu.memory_space<semaphore_mem>> -> memref<1x1x!tpu.dma_semaphore, #tpu.memory_space<semaphore_mem>>
      %108 = tpu.memref_squeeze %107 : memref<1x1x!tpu.dma_semaphore, #tpu.memory_space<semaphore_mem>> -> memref<!tpu.dma_semaphore, #tpu.memory_space<semaphore_mem>>
      tpu.enqueue_dma source(%105 : memref<1x128xf32, #tpu.memory_space<any>>) target(%106 : memref<1x128xf32, #tpu.memory_space<vmem>>) target_semaphore(%108 : memref<!tpu.dma_semaphore, #tpu.memory_space<semaphore_mem>>)
      %c7_i32 = arith.constant 7 : i32
      %109 = arith.addi %10, %c7_i32 : i32
      %110 = arith.index_cast %109 : i32 to index
      %c0_98 = arith.constant 0 : index
      %111 = memref.load %arg2[%110, %c0_98] : memref<8x2xi32, #tpu.memory_space<smem>>
      %c7_i32_99 = arith.constant 7 : i32
      %c0_i32_100 = arith.constant 0 : i32
      %c0_i32_101 = arith.constant 0 : i32
      %112 = tpu.memref_slice %arg3[%111, %c0_i32_101] : memref<32x128xf32, #tpu.memory_space<any>> -> memref<1x128xf32, #tpu.memory_space<any>>
      %c7_i32_102 = arith.constant 7 : i32
      %c0_i32_103 = arith.constant 0 : i32
      %113 = tpu.memref_slice %arg7[%c7_i32_102, %c0_i32_103] : memref<8x256xf32, #tpu.memory_space<vmem>> -> memref<1x128xf32, #tpu.memory_space<vmem>>
      %114 = tpu.memref_slice %arg8[%c7_i32_99, %c0_i32_100] : memref<8x2x!tpu.dma_semaphore, #tpu.memory_space<semaphore_mem>> -> memref<1x1x!tpu.dma_semaphore, #tpu.memory_space<semaphore_mem>>
      %115 = tpu.memref_squeeze %114 : memref<1x1x!tpu.dma_semaphore, #tpu.memory_space<semaphore_mem>> -> memref<!tpu.dma_semaphore, #tpu.memory_space<semaphore_mem>>
      tpu.enqueue_dma source(%112 : memref<1x128xf32, #tpu.memory_space<any>>) target(%113 : memref<1x128xf32, #tpu.memory_space<vmem>>) target_semaphore(%115 : memref<!tpu.dma_semaphore, #tpu.memory_space<semaphore_mem>>)
      %c7_i32_104 = arith.constant 7 : i32
      %116 = arith.addi %10, %c7_i32_104 : i32
      %117 = arith.index_cast %116 : i32 to index
      %c1_105 = arith.constant 1 : index
      %118 = memref.load %arg2[%117, %c1_105] : memref<8x2xi32, #tpu.memory_space<smem>>
      %c7_i32_106 = arith.constant 7 : i32
      %c1_i32_107 = arith.constant 1 : i32
      %c0_i32_108 = arith.constant 0 : i32
      %119 = tpu.memref_slice %arg3[%118, %c0_i32_108] : memref<32x128xf32, #tpu.memory_space<any>> -> memref<1x128xf32, #tpu.memory_space<any>>
      %c7_i32_109 = arith.constant 7 : i32
      %c128_i32_110 = arith.constant 128 : i32
      %120 = tpu.memref_slice %arg7[%c7_i32_109, %c128_i32_110] : memref<8x256xf32, #tpu.memory_space<vmem>> -> memref<1x128xf32, #tpu.memory_space<vmem>>
      %121 = tpu.memref_slice %arg8[%c7_i32_106, %c1_i32_107] : memref<8x2x!tpu.dma_semaphore, #tpu.memory_space<semaphore_mem>> -> memref<1x1x!tpu.dma_semaphore, #tpu.memory_space<semaphore_mem>>
      %122 = tpu.memref_squeeze %121 : memref<1x1x!tpu.dma_semaphore, #tpu.memory_space<semaphore_mem>> -> memref<!tpu.dma_semaphore, #tpu.memory_space<semaphore_mem>>
      tpu.enqueue_dma source(%119 : memref<1x128xf32, #tpu.memory_space<any>>) target(%120 : memref<1x128xf32, #tpu.memory_space<vmem>>) target_semaphore(%122 : memref<!tpu.dma_semaphore, #tpu.memory_space<semaphore_mem>>)
      %c0_i32_111 = arith.constant 0 : i32
      %c0_i32_112 = arith.constant 0 : i32
      %c0_i32_113 = arith.constant 0 : i32
      %123 = tpu.memref_slice %arg3[%13, %c0_i32_113] : memref<32x128xf32, #tpu.memory_space<any>> -> memref<1x128xf32, #tpu.memory_space<any>>
      %c0_i32_114 = arith.constant 0 : i32
      %c0_i32_115 = arith.constant 0 : i32
      %124 = tpu.memref_slice %arg7[%c0_i32_114, %c0_i32_115] : memref<8x256xf32, #tpu.memory_space<vmem>> -> memref<1x128xf32, #tpu.memory_space<vmem>>
      %125 = tpu.memref_slice %arg8[%c0_i32_111, %c0_i32_112] : memref<8x2x!tpu.dma_semaphore, #tpu.memory_space<semaphore_mem>> -> memref<1x1x!tpu.dma_semaphore, #tpu.memory_space<semaphore_mem>>
      %126 = tpu.memref_squeeze %125 : memref<1x1x!tpu.dma_semaphore, #tpu.memory_space<semaphore_mem>> -> memref<!tpu.dma_semaphore, #tpu.memory_space<semaphore_mem>>
      tpu.wait_dma2 semaphore(%126 : memref<!tpu.dma_semaphore, #tpu.memory_space<semaphore_mem>>) src(%123 : memref<1x128xf32, #tpu.memory_space<any>>) dst(%124 : memref<1x128xf32, #tpu.memory_space<vmem>>)
      %c0_i32_116 = arith.constant 0 : i32
      %c1_i32_117 = arith.constant 1 : i32
      %c0_i32_118 = arith.constant 0 : i32
      %127 = tpu.memref_slice %arg3[%20, %c0_i32_118] : memref<32x128xf32, #tpu.memory_space<any>> -> memref<1x128xf32, #tpu.memory_space<any>>
      %c0_i32_119 = arith.constant 0 : i32
      %c128_i32_120 = arith.constant 128 : i32
      %128 = tpu.memref_slice %arg7[%c0_i32_119, %c128_i32_120] : memref<8x256xf32, #tpu.memory_space<vmem>> -> memref<1x128xf32, #tpu.memory_space<vmem>>
      %129 = tpu.memref_slice %arg8[%c0_i32_116, %c1_i32_117] : memref<8x2x!tpu.dma_semaphore, #tpu.memory_space<semaphore_mem>> -> memref<1x1x!tpu.dma_semaphore, #tpu.memory_space<semaphore_mem>>
      %130 = tpu.memref_squeeze %129 : memref<1x1x!tpu.dma_semaphore, #tpu.memory_space<semaphore_mem>> -> memref<!tpu.dma_semaphore, #tpu.memory_space<semaphore_mem>>
      tpu.wait_dma2 semaphore(%130 : memref<!tpu.dma_semaphore, #tpu.memory_space<semaphore_mem>>) src(%127 : memref<1x128xf32, #tpu.memory_space<any>>) dst(%128 : memref<1x128xf32, #tpu.memory_space<vmem>>)
      %c1_i32_121 = arith.constant 1 : i32
      %c0_i32_122 = arith.constant 0 : i32
      %c0_i32_123 = arith.constant 0 : i32
      %131 = tpu.memref_slice %arg3[%27, %c0_i32_123] : memref<32x128xf32, #tpu.memory_space<any>> -> memref<1x128xf32, #tpu.memory_space<any>>
      %c1_i32_124 = arith.constant 1 : i32
      %c0_i32_125 = arith.constant 0 : i32
      %132 = tpu.memref_slice %arg7[%c1_i32_124, %c0_i32_125] : memref<8x256xf32, #tpu.memory_space<vmem>> -> memref<1x128xf32, #tpu.memory_space<vmem>>
      %133 = tpu.memref_slice %arg8[%c1_i32_121, %c0_i32_122] : memref<8x2x!tpu.dma_semaphore, #tpu.memory_space<semaphore_mem>> -> memref<1x1x!tpu.dma_semaphore, #tpu.memory_space<semaphore_mem>>
      %134 = tpu.memref_squeeze %133 : memref<1x1x!tpu.dma_semaphore, #tpu.memory_space<semaphore_mem>> -> memref<!tpu.dma_semaphore, #tpu.memory_space<semaphore_mem>>
      tpu.wait_dma2 semaphore(%134 : memref<!tpu.dma_semaphore, #tpu.memory_space<semaphore_mem>>) src(%131 : memref<1x128xf32, #tpu.memory_space<any>>) dst(%132 : memref<1x128xf32, #tpu.memory_space<vmem>>)
      %c1_i32_126 = arith.constant 1 : i32
      %c1_i32_127 = arith.constant 1 : i32
      %c0_i32_128 = arith.constant 0 : i32
      %135 = tpu.memref_slice %arg3[%34, %c0_i32_128] : memref<32x128xf32, #tpu.memory_space<any>> -> memref<1x128xf32, #tpu.memory_space<any>>
      %c1_i32_129 = arith.constant 1 : i32
      %c128_i32_130 = arith.constant 128 : i32
      %136 = tpu.memref_slice %arg7[%c1_i32_129, %c128_i32_130] : memref<8x256xf32, #tpu.memory_space<vmem>> -> memref<1x128xf32, #tpu.memory_space<vmem>>
      %137 = tpu.memref_slice %arg8[%c1_i32_126, %c1_i32_127] : memref<8x2x!tpu.dma_semaphore, #tpu.memory_space<semaphore_mem>> -> memref<1x1x!tpu.dma_semaphore, #tpu.memory_space<semaphore_mem>>
      %138 = tpu.memref_squeeze %137 : memref<1x1x!tpu.dma_semaphore, #tpu.memory_space<semaphore_mem>> -> memref<!tpu.dma_semaphore, #tpu.memory_space<semaphore_mem>>
      tpu.wait_dma2 semaphore(%138 : memref<!tpu.dma_semaphore, #tpu.memory_space<semaphore_mem>>) src(%135 : memref<1x128xf32, #tpu.memory_space<any>>) dst(%136 : memref<1x128xf32, #tpu.memory_space<vmem>>)
      %c2_i32_131 = arith.constant 2 : i32
      %c0_i32_132 = arith.constant 0 : i32
      %c0_i32_133 = arith.constant 0 : i32
      %139 = tpu.memref_slice %arg3[%41, %c0_i32_133] : memref<32x128xf32, #tpu.memory_space<any>> -> memref<1x128xf32, #tpu.memory_space<any>>
      %c2_i32_134 = arith.constant 2 : i32
      %c0_i32_135 = arith.constant 0 : i32
      %140 = tpu.memref_slice %arg7[%c2_i32_134, %c0_i32_135] : memref<8x256xf32, #tpu.memory_space<vmem>> -> memref<1x128xf32, #tpu.memory_space<vmem>>
      %141 = tpu.memref_slice %arg8[%c2_i32_131, %c0_i32_132] : memref<8x2x!tpu.dma_semaphore, #tpu.memory_space<semaphore_mem>> -> memref<1x1x!tpu.dma_semaphore, #tpu.memory_space<semaphore_mem>>
      %142 = tpu.memref_squeeze %141 : memref<1x1x!tpu.dma_semaphore, #tpu.memory_space<semaphore_mem>> -> memref<!tpu.dma_semaphore, #tpu.memory_space<semaphore_mem>>
      tpu.wait_dma2 semaphore(%142 : memref<!tpu.dma_semaphore, #tpu.memory_space<semaphore_mem>>) src(%139 : memref<1x128xf32, #tpu.memory_space<any>>) dst(%140 : memref<1x128xf32, #tpu.memory_space<vmem>>)
      %c2_i32_136 = arith.constant 2 : i32
      %c1_i32_137 = arith.constant 1 : i32
      %c0_i32_138 = arith.constant 0 : i32
      %143 = tpu.memref_slice %arg3[%48, %c0_i32_138] : memref<32x128xf32, #tpu.memory_space<any>> -> memref<1x128xf32, #tpu.memory_space<any>>
      %c2_i32_139 = arith.constant 2 : i32
      %c128_i32_140 = arith.constant 128 : i32
      %144 = tpu.memref_slice %arg7[%c2_i32_139, %c128_i32_140] : memref<8x256xf32, #tpu.memory_space<vmem>> -> memref<1x128xf32, #tpu.memory_space<vmem>>
      %145 = tpu.memref_slice %arg8[%c2_i32_136, %c1_i32_137] : memref<8x2x!tpu.dma_semaphore, #tpu.memory_space<semaphore_mem>> -> memref<1x1x!tpu.dma_semaphore, #tpu.memory_space<semaphore_mem>>
      %146 = tpu.memref_squeeze %145 : memref<1x1x!tpu.dma_semaphore, #tpu.memory_space<semaphore_mem>> -> memref<!tpu.dma_semaphore, #tpu.memory_space<semaphore_mem>>
      tpu.wait_dma2 semaphore(%146 : memref<!tpu.dma_semaphore, #tpu.memory_space<semaphore_mem>>) src(%143 : memref<1x128xf32, #tpu.memory_space<any>>) dst(%144 : memref<1x128xf32, #tpu.memory_space<vmem>>)
      %c3_i32_141 = arith.constant 3 : i32
      %c0_i32_142 = arith.constant 0 : i32
      %c0_i32_143 = arith.constant 0 : i32
      %147 = tpu.memref_slice %arg3[%55, %c0_i32_143] : memref<32x128xf32, #tpu.memory_space<any>> -> memref<1x128xf32, #tpu.memory_space<any>>
      %c3_i32_144 = arith.constant 3 : i32
      %c0_i32_145 = arith.constant 0 : i32
      %148 = tpu.memref_slice %arg7[%c3_i32_144, %c0_i32_145] : memref<8x256xf32, #tpu.memory_space<vmem>> -> memref<1x128xf32, #tpu.memory_space<vmem>>
      %149 = tpu.memref_slice %arg8[%c3_i32_141, %c0_i32_142] : memref<8x2x!tpu.dma_semaphore, #tpu.memory_space<semaphore_mem>> -> memref<1x1x!tpu.dma_semaphore, #tpu.memory_space<semaphore_mem>>
      %150 = tpu.memref_squeeze %149 : memref<1x1x!tpu.dma_semaphore, #tpu.memory_space<semaphore_mem>> -> memref<!tpu.dma_semaphore, #tpu.memory_space<semaphore_mem>>
      tpu.wait_dma2 semaphore(%150 : memref<!tpu.dma_semaphore, #tpu.memory_space<semaphore_mem>>) src(%147 : memref<1x128xf32, #tpu.memory_space<any>>) dst(%148 : memref<1x128xf32, #tpu.memory_space<vmem>>)
      %c3_i32_146 = arith.constant 3 : i32
      %c1_i32_147 = arith.constant 1 : i32
      %c0_i32_148 = arith.constant 0 : i32
      %151 = tpu.memref_slice %arg3[%62, %c0_i32_148] : memref<32x128xf32, #tpu.memory_space<any>> -> memref<1x128xf32, #tpu.memory_space<any>>
      %c3_i32_149 = arith.constant 3 : i32
      %c128_i32_150 = arith.constant 128 : i32
      %152 = tpu.memref_slice %arg7[%c3_i32_149, %c128_i32_150] : memref<8x256xf32, #tpu.memory_space<vmem>> -> memref<1x128xf32, #tpu.memory_space<vmem>>
      %153 = tpu.memref_slice %arg8[%c3_i32_146, %c1_i32_147] : memref<8x2x!tpu.dma_semaphore, #tpu.memory_space<semaphore_mem>> -> memref<1x1x!tpu.dma_semaphore, #tpu.memory_space<semaphore_mem>>
      %154 = tpu.memref_squeeze %153 : memref<1x1x!tpu.dma_semaphore, #tpu.memory_space<semaphore_mem>> -> memref<!tpu.dma_semaphore, #tpu.memory_space<semaphore_mem>>
      tpu.wait_dma2 semaphore(%154 : memref<!tpu.dma_semaphore, #tpu.memory_space<semaphore_mem>>) src(%151 : memref<1x128xf32, #tpu.memory_space<any>>) dst(%152 : memref<1x128xf32, #tpu.memory_space<vmem>>)
      %c4_i32_151 = arith.constant 4 : i32
      %c0_i32_152 = arith.constant 0 : i32
      %c0_i32_153 = arith.constant 0 : i32
      %155 = tpu.memref_slice %arg3[%69, %c0_i32_153] : memref<32x128xf32, #tpu.memory_space<any>> -> memref<1x128xf32, #tpu.memory_space<any>>
      %c4_i32_154 = arith.constant 4 : i32
      %c0_i32_155 = arith.constant 0 : i32
      %156 = tpu.memref_slice %arg7[%c4_i32_154, %c0_i32_155] : memref<8x256xf32, #tpu.memory_space<vmem>> -> memref<1x128xf32, #tpu.memory_space<vmem>>
      %157 = tpu.memref_slice %arg8[%c4_i32_151, %c0_i32_152] : memref<8x2x!tpu.dma_semaphore, #tpu.memory_space<semaphore_mem>> -> memref<1x1x!tpu.dma_semaphore, #tpu.memory_space<semaphore_mem>>
      %158 = tpu.memref_squeeze %157 : memref<1x1x!tpu.dma_semaphore, #tpu.memory_space<semaphore_mem>> -> memref<!tpu.dma_semaphore, #tpu.memory_space<semaphore_mem>>
      tpu.wait_dma2 semaphore(%158 : memref<!tpu.dma_semaphore, #tpu.memory_space<semaphore_mem>>) src(%155 : memref<1x128xf32, #tpu.memory_space<any>>) dst(%156 : memref<1x128xf32, #tpu.memory_space<vmem>>)
      %c4_i32_156 = arith.constant 4 : i32
      %c1_i32_157 = arith.constant 1 : i32
      %c0_i32_158 = arith.constant 0 : i32
      %159 = tpu.memref_slice %arg3[%76, %c0_i32_158] : memref<32x128xf32, #tpu.memory_space<any>> -> memref<1x128xf32, #tpu.memory_space<any>>
      %c4_i32_159 = arith.constant 4 : i32
      %c128_i32_160 = arith.constant 128 : i32
      %160 = tpu.memref_slice %arg7[%c4_i32_159, %c128_i32_160] : memref<8x256xf32, #tpu.memory_space<vmem>> -> memref<1x128xf32, #tpu.memory_space<vmem>>
      %161 = tpu.memref_slice %arg8[%c4_i32_156, %c1_i32_157] : memref<8x2x!tpu.dma_semaphore, #tpu.memory_space<semaphore_mem>> -> memref<1x1x!tpu.dma_semaphore, #tpu.memory_space<semaphore_mem>>
      %162 = tpu.memref_squeeze %161 : memref<1x1x!tpu.dma_semaphore, #tpu.memory_space<semaphore_mem>> -> memref<!tpu.dma_semaphore, #tpu.memory_space<semaphore_mem>>
      tpu.wait_dma2 semaphore(%162 : memref<!tpu.dma_semaphore, #tpu.memory_space<semaphore_mem>>) src(%159 : memref<1x128xf32, #tpu.memory_space<any>>) dst(%160 : memref<1x128xf32, #tpu.memory_space<vmem>>)
      %c5_i32_161 = arith.constant 5 : i32
      %c0_i32_162 = arith.constant 0 : i32
      %c0_i32_163 = arith.constant 0 : i32
      %163 = tpu.memref_slice %arg3[%83, %c0_i32_163] : memref<32x128xf32, #tpu.memory_space<any>> -> memref<1x128xf32, #tpu.memory_space<any>>
      %c5_i32_164 = arith.constant 5 : i32
      %c0_i32_165 = arith.constant 0 : i32
      %164 = tpu.memref_slice %arg7[%c5_i32_164, %c0_i32_165] : memref<8x256xf32, #tpu.memory_space<vmem>> -> memref<1x128xf32, #tpu.memory_space<vmem>>
      %165 = tpu.memref_slice %arg8[%c5_i32_161, %c0_i32_162] : memref<8x2x!tpu.dma_semaphore, #tpu.memory_space<semaphore_mem>> -> memref<1x1x!tpu.dma_semaphore, #tpu.memory_space<semaphore_mem>>
      %166 = tpu.memref_squeeze %165 : memref<1x1x!tpu.dma_semaphore, #tpu.memory_space<semaphore_mem>> -> memref<!tpu.dma_semaphore, #tpu.memory_space<semaphore_mem>>
      tpu.wait_dma2 semaphore(%166 : memref<!tpu.dma_semaphore, #tpu.memory_space<semaphore_mem>>) src(%163 : memref<1x128xf32, #tpu.memory_space<any>>) dst(%164 : memref<1x128xf32, #tpu.memory_space<vmem>>)
      %c5_i32_166 = arith.constant 5 : i32
      %c1_i32_167 = arith.constant 1 : i32
      %c0_i32_168 = arith.constant 0 : i32
      %167 = tpu.memref_slice %arg3[%90, %c0_i32_168] : memref<32x128xf32, #tpu.memory_space<any>> -> memref<1x128xf32, #tpu.memory_space<any>>
      %c5_i32_169 = arith.constant 5 : i32
      %c128_i32_170 = arith.constant 128 : i32
      %168 = tpu.memref_slice %arg7[%c5_i32_169, %c128_i32_170] : memref<8x256xf32, #tpu.memory_space<vmem>> -> memref<1x128xf32, #tpu.memory_space<vmem>>
      %169 = tpu.memref_slice %arg8[%c5_i32_166, %c1_i32_167] : memref<8x2x!tpu.dma_semaphore, #tpu.memory_space<semaphore_mem>> -> memref<1x1x!tpu.dma_semaphore, #tpu.memory_space<semaphore_mem>>
      %170 = tpu.memref_squeeze %169 : memref<1x1x!tpu.dma_semaphore, #tpu.memory_space<semaphore_mem>> -> memref<!tpu.dma_semaphore, #tpu.memory_space<semaphore_mem>>
      tpu.wait_dma2 semaphore(%170 : memref<!tpu.dma_semaphore, #tpu.memory_space<semaphore_mem>>) src(%167 : memref<1x128xf32, #tpu.memory_space<any>>) dst(%168 : memref<1x128xf32, #tpu.memory_space<vmem>>)
      %c6_i32_171 = arith.constant 6 : i32
      %c0_i32_172 = arith.constant 0 : i32
      %c0_i32_173 = arith.constant 0 : i32
      %171 = tpu.memref_slice %arg3[%97, %c0_i32_173] : memref<32x128xf32, #tpu.memory_space<any>> -> memref<1x128xf32, #tpu.memory_space<any>>
      %c6_i32_174 = arith.constant 6 : i32
      %c0_i32_175 = arith.constant 0 : i32
      %172 = tpu.memref_slice %arg7[%c6_i32_174, %c0_i32_175] : memref<8x256xf32, #tpu.memory_space<vmem>> -> memref<1x128xf32, #tpu.memory_space<vmem>>
      %173 = tpu.memref_slice %arg8[%c6_i32_171, %c0_i32_172] : memref<8x2x!tpu.dma_semaphore, #tpu.memory_space<semaphore_mem>> -> memref<1x1x!tpu.dma_semaphore, #tpu.memory_space<semaphore_mem>>
      %174 = tpu.memref_squeeze %173 : memref<1x1x!tpu.dma_semaphore, #tpu.memory_space<semaphore_mem>> -> memref<!tpu.dma_semaphore, #tpu.memory_space<semaphore_mem>>
      tpu.wait_dma2 semaphore(%174 : memref<!tpu.dma_semaphore, #tpu.memory_space<semaphore_mem>>) src(%171 : memref<1x128xf32, #tpu.memory_space<any>>) dst(%172 : memref<1x128xf32, #tpu.memory_space<vmem>>)
      %c6_i32_176 = arith.constant 6 : i32
      %c1_i32_177 = arith.constant 1 : i32
      %c0_i32_178 = arith.constant 0 : i32
      %175 = tpu.memref_slice %arg3[%104, %c0_i32_178] : memref<32x128xf32, #tpu.memory_space<any>> -> memref<1x128xf32, #tpu.memory_space<any>>
      %c6_i32_179 = arith.constant 6 : i32
      %c128_i32_180 = arith.constant 128 : i32
      %176 = tpu.memref_slice %arg7[%c6_i32_179, %c128_i32_180] : memref<8x256xf32, #tpu.memory_space<vmem>> -> memref<1x128xf32, #tpu.memory_space<vmem>>
      %177 = tpu.memref_slice %arg8[%c6_i32_176, %c1_i32_177] : memref<8x2x!tpu.dma_semaphore, #tpu.memory_space<semaphore_mem>> -> memref<1x1x!tpu.dma_semaphore, #tpu.memory_space<semaphore_mem>>
      %178 = tpu.memref_squeeze %177 : memref<1x1x!tpu.dma_semaphore, #tpu.memory_space<semaphore_mem>> -> memref<!tpu.dma_semaphore, #tpu.memory_space<semaphore_mem>>
      tpu.wait_dma2 semaphore(%178 : memref<!tpu.dma_semaphore, #tpu.memory_space<semaphore_mem>>) src(%175 : memref<1x128xf32, #tpu.memory_space<any>>) dst(%176 : memref<1x128xf32, #tpu.memory_space<vmem>>)
      %c7_i32_181 = arith.constant 7 : i32
      %c0_i32_182 = arith.constant 0 : i32
      %c0_i32_183 = arith.constant 0 : i32
      %179 = tpu.memref_slice %arg3[%111, %c0_i32_183] : memref<32x128xf32, #tpu.memory_space<any>> -> memref<1x128xf32, #tpu.memory_space<any>>
      %c7_i32_184 = arith.constant 7 : i32
      %c0_i32_185 = arith.constant 0 : i32
      %180 = tpu.memref_slice %arg7[%c7_i32_184, %c0_i32_185] : memref<8x256xf32, #tpu.memory_space<vmem>> -> memref<1x128xf32, #tpu.memory_space<vmem>>
      %181 = tpu.memref_slice %arg8[%c7_i32_181, %c0_i32_182] : memref<8x2x!tpu.dma_semaphore, #tpu.memory_space<semaphore_mem>> -> memref<1x1x!tpu.dma_semaphore, #tpu.memory_space<semaphore_mem>>
      %182 = tpu.memref_squeeze %181 : memref<1x1x!tpu.dma_semaphore, #tpu.memory_space<semaphore_mem>> -> memref<!tpu.dma_semaphore, #tpu.memory_space<semaphore_mem>>
      tpu.wait_dma2 semaphore(%182 : memref<!tpu.dma_semaphore, #tpu.memory_space<semaphore_mem>>) src(%179 : memref<1x128xf32, #tpu.memory_space<any>>) dst(%180 : memref<1x128xf32, #tpu.memory_space<vmem>>)
      %c7_i32_186 = arith.constant 7 : i32
      %c1_i32_187 = arith.constant 1 : i32
      %c0_i32_188 = arith.constant 0 : i32
      %183 = tpu.memref_slice %arg3[%118, %c0_i32_188] : memref<32x128xf32, #tpu.memory_space<any>> -> memref<1x128xf32, #tpu.memory_space<any>>
      %c7_i32_189 = arith.constant 7 : i32
      %c128_i32_190 = arith.constant 128 : i32
      %184 = tpu.memref_slice %arg7[%c7_i32_189, %c128_i32_190] : memref<8x256xf32, #tpu.memory_space<vmem>> -> memref<1x128xf32, #tpu.memory_space<vmem>>
      %185 = tpu.memref_slice %arg8[%c7_i32_186, %c1_i32_187] : memref<8x2x!tpu.dma_semaphore, #tpu.memory_space<semaphore_mem>> -> memref<1x1x!tpu.dma_semaphore, #tpu.memory_space<semaphore_mem>>
      %186 = tpu.memref_squeeze %185 : memref<1x1x!tpu.dma_semaphore, #tpu.memory_space<semaphore_mem>> -> memref<!tpu.dma_semaphore, #tpu.memory_space<semaphore_mem>>
      tpu.wait_dma2 semaphore(%186 : memref<!tpu.dma_semaphore, #tpu.memory_space<semaphore_mem>>) src(%183 : memref<1x128xf32, #tpu.memory_space<any>>) dst(%184 : memref<1x128xf32, #tpu.memory_space<vmem>>)
    } else {
    }
    %c0 = arith.constant 0 : index
    %c0_1 = arith.constant 0 : index
    %3 = vector.load %arg7[%c0, %c0_1] : memref<8x256xf32, #tpu.memory_space<vmem>>, vector<8x256xf32>
    %c0_2 = arith.constant 0 : index
    %c0_3 = arith.constant 0 : index
    %4 = vector.load %arg4[%c0_2, %c0_3] : memref<256x128xf32, #tpu.memory_space<vmem>>, vector<256x128xf32>
    %cst = arith.constant dense<0.000000e+00> : vector<8x128xf32>
    %5 = tpu.matmul %3, %4, %cst {dimension_numbers = #tpu.dot_dimension_numbers<[1], [0], [0], [1], [0, 0, 1, 1], [], []>} : vector<8x256xf32>, vector<256x128xf32>, vector<8x128xf32> -> vector<8x128xf32>
    %c0_4 = arith.constant 0 : index
    %c0_5 = arith.constant 0 : index
    %6 = vector.load %arg5[%c0_4, %c0_5] : memref<1x128xf32, #tpu.memory_space<vmem>>, vector<1x128xf32>
    %7 = vector.broadcast %6 : vector<1x128xf32> to vector<8x128xf32>
    %8 = arith.addf %5, %7 : vector<8x128xf32>
    %c0_6 = arith.constant 0 : index
    %c0_7 = arith.constant 0 : index
    %9 = vector.load %arg6[%c0_6, %c0_7] : memref<8x128xf32, #tpu.memory_space<vmem>>, vector<8x128xf32>
    tpu.vector_store %arg6[%c0_6, %c0_7], %8 {strides = array<i32>} : memref<8x128xf32, #tpu.memory_space<vmem>>, vector<8x128xf32>,
    return
  }
  func.func @transform_1(%arg0: i32, %arg1: i32, %arg2: memref<8x2xi32, #tpu.memory_space<smem>>) -> (i32, i32) {
    %c0_i32 = arith.constant 0 : i32
    %c0_i32_0 = arith.constant 0 : i32
    return %c0_i32, %arg1 : i32, i32
  }
  func.func @transform_2(%arg0: i32, %arg1: i32, %arg2: memref<8x2xi32, #tpu.memory_space<smem>>) -> (i32, i32) {
    %c0_i32 = arith.constant 0 : i32
    %c0_i32_0 = arith.constant 0 : i32
    return %c0_i32, %arg1 : i32, i32
  }
  func.func @transform_3(%arg0: i32, %arg1: i32, %arg2: memref<8x2xi32, #tpu.memory_space<smem>>) -> (i32, i32) {
    %c0_i32 = arith.constant 0 : i32
    return %arg0, %arg1 : i32, i32
  }
}

</mosaic_0001>

<bundles_post_ra>
// kernel: tpu_custom_call.1
= control target key start
LH: loop header
LB: loop body
LE: loop exit
PB: predicated region body
PF: predicated region fallthrough
CT: control target
= control target key end

     0   :  { %s1462_s0 = inlined_call_operand.vmem [shape: s32[8,2], index: 0, kind: input, shape index: {}]   ;;  %s1463_s1 = inlined_call_operand.hbm [shape: f32[32,128], index: 1, kind: input, shape index: {}]   ;;  %s1464_s2 = inlined_call_operand.hbm [shape: f32[256,128], index: 2, kind: input, shape index: {}]   ;;  %s1465_s3 = inlined_call_operand.vmem [shape: f32[1,128], index: 3, kind: input, shape index: {}]   ;;  %s1466_s4 = inlined_call_operand.hbm [shape: f32[8,128], index: 4, kind: output, shape index: {}]  }
   0x1   :  { %s9_s17 = sshll.u32 %s1462_s0, 4  ;;  %s10_s17 = int_to_ptr.vmem [resolvable:$true] %s9_s17 }
   0x2   :  { %s723_s18 = scalar_lea.vmem %s10_s17, 128  ;;  %p728_p1 = scmp.lt.s32.totalorder %s10_s17, %s10_s17 }
   0x3   :  { %p724_p0 = scmp.ne.s32.totalorder %s10_s17, %s723_s18  ;;  %p729_p2 = scmp.lt.s32.totalorder %s723_s18, %s723_s18 }
   0x5   :  { %p730_p3 = por %p729_p2, %p728_p1 }
   0x7   :  { %p731_p4 = pnand %p730_p3, %p724_p0 }
   0x9   :  { %734 = shalt.err (!%p731_p4)  }
   0xa   :  { %s1165_s19 = smov [#allocation5]  }
   0xb   :  { %12 = dma.vmem_to_smem %s10_s17, 128, %s1165_s19, [#allocation4] }
   0xc   :  { %1127 = dma.done.wait [#allocation4], 128 }
   0xd   :  { %1128 = vsyncadd [#allocation4], 4294967168 }
   0xe   :  { %14 = sfence }
   0xf   :  { %15 = vsyncpa [#allocation7], 0 }
  0x10   :  { %16 = vsyncpa [#allocation8], 0  ;;  %s1166_s20 = smov [#allocation6]  }
  0x11   :  { %s22_s21 = sshll.u32 %s1166_s20, 4  ;;  %s23_s21 = int_to_ptr.vmem [resolvable:$true] %s22_s21 }
  0x12   :  { %s743_s22 = scalar_lea.vmem %s23_s21, 4096  ;;  %p748_p6 = scmp.lt.s32.totalorder %s23_s21, %s23_s21 }
  0x13   :  { %p744_p5 = scmp.ne.s32.totalorder %s23_s21, %s743_s22  ;;  %p749_p7 = scmp.lt.s32.totalorder %s743_s22, %s743_s22 }
  0x15   :  { %p750_p8 = por %p749_p7, %p748_p6 }
  0x17   :  { %p751_p9 = pnand %p750_p8, %p744_p5 }
  0x19   :  { %754 = shalt.err (!%p751_p9)
}
  0x1a   :  { %s1167_s0 = smov 128   ;;  %s1168_s23 = smov 8  }
  0x1b   :  { %28 = dma.hbm_to_vmem [thread:$0]  %s1464_s2, 4096, %s23_s21, [#allocation7], %s1167_s0, %s1167_s0, %s1168_s23  }
  0x1c   :  { %1129 = dma.done.wait [#allocation7], 4096  }
  0x1d   :  { %1130 = vsyncadd [#allocation7], 4294963200  ;;  %s40_s26 = sld [smem:[#allocation5]]  ;;  %s1169_s27 = smov [#allocation2]  }
  0x1e   :  { %s50_s28 = sshll.u32 %s1169_s27, 4  ;;  %s1219_s29 = sld [smem:[#allocation5 + $0x1]]  ;;  %s1217_s28 = int_to_ptr.vmem [resolvable:$true] %s50_s28 }
  0x1f   :  { %s1170_s30 = smov [#allocation2 + $0x8]   ;;  %s1221_s6 = sld [smem:[#allocation5 + $0x80]] }
  0x20   :  { %s67_s5 = sshll.u32 %s1170_s30, 4  ;;  %s1171_s7 = smov [#allocation2 + $0x1]   ;;  %s1223_s5 = int_to_ptr.vmem [resolvable:$true] %s67_s5 }
  0x21   :  { %s85_s8 = sshll.u32 %s1171_s7, 4  ;;  %s1225_s9 = sld [smem:[#allocation5 + $0x81]]  ;;  %s1227_s8 = int_to_ptr.vmem [resolvable:$true] %s85_s8 }
  0x22   :  { %s1172_s10 = smov [#allocation2 + $0x9]   ;;  %s1238_s19 = scalar_lea.hbm %s1463_s1, 512 }
  0x23   :  { %s619_s2 = sshll.u32 %s40_s26, 4  ;;  %s1229_s11 = sshll.u32 %s1172_s10, 4  ;;  %s103_s11 = int_to_ptr.vmem [resolvable:$true] %s1229_s11 }
  0x24   :  { %s42_s14 = scalar_lea.hbm %s1463_s1, %s619_s2  ;;  %s621_s15 = sshll.u32 %s1219_s29, 4 }
  0x25   :  { %s755_s16 = scalar_lea.hbm %s42_s14, 16  ;;  %p758_p11 = scmp.lt.s32.totalorder %s42_s14, %s1463_s1 }
  0x26   :  { %p756_p10 = scmp.ne.s32.totalorder %s42_s14, %s755_s16  ;;  %p759_p12 = scmp.lt.s32.totalorder %s1238_s19, %s755_s16 }
  0x28   :  { %p760_p13 = por %p759_p12, %p758_p11 }
  0x2a   :  { %p761_p0 = pnand %p760_p13, %p756_p10 }
  0x2c   :  { %764 = shalt.err (!%p761_p0)  }
  0x2d   :  { %s765_s22 = scalar_lea.vmem %s1217_s28, 16  ;;  %s1247_s0 = scalar_lea.vmem %s1217_s28, 256 }
  0x2e   :  { %p766_p1 = scmp.ne.s32.totalorder %s1217_s28, %s765_s22  ;;  %p770_p2 = scmp.lt.s32.totalorder %s1217_s28, %s1217_s28 }
  0x2f   :  { %p771_p3 = scmp.lt.s32.totalorder %s1247_s0, %s765_s22 }
  0x31   :  { %p772_p4 = por %p771_p3, %p770_p2 }
  0x33   :  { %p773_p5 = pnand %p772_p4, %p766_p1 }
  0x35   :  { %776 = shalt.err (!%p773_p5)  }
  0x36   :  { %53 = dma.hbm_to_vmem [thread:$0]  %s42_s14, 16, %s1217_s28, [#allocation3] }
  0x37   :  { %s57_s25 = scalar_lea.hbm %s1463_s1, %s621_s15  ;;  %s623_s26 = sshll.u32 %s1221_s6, 4 }
  0x38   :  { %s777_s27 = scalar_lea.hbm %s57_s25, 16  ;;  %p780_p7 = scmp.lt.s32.totalorder %s57_s25, %s1463_s1 }
  0x39   :  { %p778_p6 = scmp.ne.s32.totalorder %s57_s25, %s777_s27  ;;  %p781_p8 = scmp.lt.s32.totalorder %s1238_s19, %s777_s27 }
  0x3b   :  { %p782_p9 = por %p781_p8, %p780_p7 }
  0x3d   :  { %p783_p10 = pnand %p782_p9, %p778_p6 }
  0x3f   :  { %786 = shalt.err (!%p783_p10)  }
  0x40   :  { %s787_s7 = scalar_lea.vmem %s1223_s5, 16  ;;  %p792_p12 = scmp.lt.s32.totalorder %s1223_s5, %s1217_s28 }
  0x41   :  { %p788_p11 = scmp.ne.s32.totalorder %s1223_s5, %s787_s7  ;;  %p793_p13 = scmp.lt.s32.totalorder %s1247_s0, %s787_s7 }
  0x43   :  { %p794_p0 = por %p793_p13, %p792_p12 }
  0x45   :  { %p795_p1 = pnand %p794_p0, %p788_p11 }
  0x47   :  { %798 = shalt.err (!%p795_p1)  }
  0x48   :  { %70 = dma.hbm_to_vmem [thread:$0]  %s57_s25, 16, %s1223_s5, [#allocation3 + $0x1] }
  0x49   :  { %s75_s10 = scalar_lea.hbm %s1463_s1, %s623_s26  ;;  %s625_s12 = sshll.u32 %s1225_s9, 4 }
  0x4a   :  { %s799_s13 = scalar_lea.hbm %s75_s10, 16  ;;  %p802_p3 = scmp.lt.s32.totalorder %s75_s10, %s1463_s1 }
  0x4b   :  { %p800_p2 = scmp.ne.s32.totalorder %s75_s10, %s799_s13  ;;  %p803_p4 = scmp.lt.s32.totalorder %s1238_s19, %s799_s13 }
  0x4d   :  { %p804_p5 = por %p803_p4, %p802_p3 }
  0x4f   :  { %p805_p6 = pnand %p804_p5, %p800_p2 }
  0x51   :  { %808 = shalt.err (!%p805_p6)  }
  0x52   :  { %s809_s5 = scalar_lea.vmem %s1227_s8, 16  ;;  %p814_p8 = scmp.lt.s32.totalorder %s1227_s8, %s1217_s28 }
  0x53   :  { %p810_p7 = scmp.ne.s32.totalorder %s1227_s8, %s809_s5  ;;  %p815_p9 = scmp.lt.s32.totalorder %s1247_s0, %s809_s5 }
  0x55   :  { %p816_p10 = por %p815_p9, %p814_p8 }
  0x57   :  { %p817_p11 = pnand %p816_p10, %p810_p7 }
  0x59   :  { %820 = shalt.err (!%p817_p11)  }
  0x5a   :  { %88 = dma.hbm_to_vmem [thread:$0]  %s75_s10, 16, %s1227_s8, [#allocation3 + $0x2] }
  0x5b   :  { %s92_s17 = scalar_lea.hbm %s1463_s1, %s625_s12 }
  0x5c   :  { %s821_s18 = scalar_lea.hbm %s92_s17, 16  ;;  %p824_p13 = scmp.lt.s32.totalorder %s92_s17, %s1463_s1 }
  0x5d   :  { %p822_p12 = scmp.ne.s32.totalorder %s92_s17, %s821_s18  ;;  %p825_p0 = scmp.lt.s32.totalorder %s1238_s19, %s821_s18 }
  0x5f   :  { %p826_p1 = por %p825_p0, %p824_p13 }
  0x61   :  { %p827_p2 = pnand %p826_p1, %p822_p12 }
  0x63   :  { %830 = shalt.err (!%p827_p2)  }
  0x64   :  { %s831_s22 = scalar_lea.vmem %s103_s11, 16  ;;  %p836_p4 = scmp.lt.s32.totalorder %s103_s11, %s1217_s28 }
  0x65   :  { %p832_p3 = scmp.ne.s32.totalorder %s103_s11, %s831_s22  ;;  %p837_p5 = scmp.lt.s32.totalorder %s1247_s0, %s831_s22 }
  0x67   :  { %p838_p6 = por %p837_p5, %p836_p4 }
  0x69   :  { %p839_p7 = pnand %p838_p6, %p832_p3 }
  0x6b   :  { %842 = shalt.err (!%p839_p7)  }
  0x6c   :  { %105 = dma.hbm_to_vmem [thread:$0]  %s92_s17, 16, %s103_s11, [#allocation3 + $0x3] }
  0x6d   :  { %s626_s8 = sld [smem:[#allocation5 + $0x100]]  ;;  %s1173_s23 = smov [#allocation2 + $0x2]  }
  0x6e   :  { %s120_s24 = sshll.u32 %s1173_s23, 4  ;;  %s1291_s25 = sld [smem:[#allocation5 + $0x101]]  ;;  %s121_s24 = int_to_ptr.vmem [resolvable:$true] %s120_s24 }
  0x6f   :  { %s1174_s26 = smov [#allocation2 + $0xa]   ;;  %s1293_s29 = sld [smem:[#allocation5 + $0x180]] }
  0x70   :  { %s137_s27 = sshll.u32 %s1174_s26, 4  ;;  %s1175_s30 = smov [#allocation2 + $0x3]   ;;  %s1295_s27 = int_to_ptr.vmem [resolvable:$true] %s137_s27 }
  0x71   :  { %s155_s7 = sshll.u32 %s1175_s30, 4  ;;  %s1297_s6 = sld [smem:[#allocation5 + $0x181]]  ;;  %s1299_s7 = int_to_ptr.vmem [resolvable:$true] %s155_s7 }
  0x73   :  { %s627_s2 = sshll.u32 %s626_s8, 4 }
  0x74   :  { %s110_s12 = scalar_lea.hbm %s1463_s1, %s627_s2  ;;  %s629_s13 = sshll.u32 %s1291_s25, 4 }
  0x75   :  { %s843_s14 = scalar_lea.hbm %s110_s12, 16  ;;  %p846_p9 = scmp.lt.s32.totalorder %s110_s12, %s1463_s1 }
  0x76   :  { %p844_p8 = scmp.ne.s32.totalorder %s110_s12, %s843_s14  ;;  %p847_p10 = scmp.lt.s32.totalorder %s1238_s19, %s843_s14 }
  0x78   :  { %p848_p11 = por %p847_p10, %p846_p9 }
  0x7a   :  { %p849_p12 = pnand %p848_p11, %p844_p8 }
  0x7c   :  { %852 = shalt.err (!%p849_p12)  }
  0x7d   :  { %s853_s9 = scalar_lea.vmem %s121_s24, 16  ;;  %p858_p0 = scmp.lt.s32.totalorder %s121_s24, %s1217_s28 }
  0x7e   :  { %p854_p13 = scmp.ne.s32.totalorder %s121_s24, %s853_s9  ;;  %p859_p1 = scmp.lt.s32.totalorder %s1247_s0, %s853_s9 }
  0x80   :  { %p860_p2 = por %p859_p1, %p858_p0 }
  0x82   :  { %p861_p3 = pnand %p860_p2, %p854_p13 }
  0x84   :  { %864 = shalt.err (!%p861_p3)  }
  0x85   :  { %123 = dma.hbm_to_vmem [thread:$0]  %s110_s12, 16, %s121_s24, [#allocation3 + $0x4] }
  0x86   :  { %s127_s18 = scalar_lea.hbm %s1463_s1, %s629_s13  ;;  %s631_s20 = sshll.u32 %s1293_s29, 4 }
  0x87   :  { %s865_s21 = scalar_lea.hbm %s127_s18, 16  ;;  %p868_p5 = scmp.lt.s32.totalorder %s127_s18, %s1463_s1 }
  0x88   :  { %p866_p4 = scmp.ne.s32.totalorder %s127_s18, %s865_s21  ;;  %p869_p6 = scmp.lt.s32.totalorder %s1238_s19, %s865_s21 }
  0x8a   :  { %p870_p7 = por %p869_p6, %p868_p5 }
  0x8c   :  { %p871_p8 = pnand %p870_p7, %p866_p4 }
  0x8e   :  { %874 = shalt.err (!%p871_p8)  }
  0x8f   :  { %s875_s23 = scalar_lea.vmem %s1295_s27, 16  ;;  %p880_p10 = scmp.lt.s32.totalorder %s1295_s27, %s1217_s28 }
  0x90   :  { %p876_p9 = scmp.ne.s32.totalorder %s1295_s27, %s875_s23  ;;  %p881_p11 = scmp.lt.s32.totalorder %s1247_s0, %s875_s23 }
  0x92   :  { %p882_p12 = por %p881_p11, %p880_p10 }
  0x94   :  { %p883_p13 = pnand %p882_p12, %p876_p9 }
  0x96   :  { %886 = shalt.err (!%p883_p13)  }
  0x97   :  { %140 = dma.hbm_to_vmem [thread:$0]  %s127_s18, 16, %s1295_s27, [#allocation3 + $0x5] }
  0x98   :  { %s145_s26 = scalar_lea.hbm %s1463_s1, %s631_s20  ;;  %s633_s29 = sshll.u32 %s1297_s6, 4 }
  0x99   :  { %s887_s30 = scalar_lea.hbm %s145_s26, 16  ;;  %p890_p1 = scmp.lt.s32.totalorder %s145_s26, %s1463_s1 }
  0x9a   :  { %p888_p0 = scmp.ne.s32.totalorder %s145_s26, %s887_s30  ;;  %p891_p2 = scmp.lt.s32.totalorder %s1238_s19, %s887_s30 }
  0x9c   :  { %p892_p3 = por %p891_p2, %p890_p1 }
  0x9e   :  { %p893_p4 = pnand %p892_p3, %p888_p0 }
  0xa0   :  { %896 = shalt.err (!%p893_p4)  }
  0xa1   :  { %s897_s27 = scalar_lea.vmem %s1299_s7, 16  ;;  %p902_p6 = scmp.lt.s32.totalorder %s1299_s7, %s1217_s28 }
  0xa2   :  { %p898_p5 = scmp.ne.s32.totalorder %s1299_s7, %s897_s27  ;;  %p903_p7 = scmp.lt.s32.totalorder %s1247_s0, %s897_s27 }
  0xa4   :  { %p904_p8 = por %p903_p7, %p902_p6 }
  0xa6   :  { %p905_p9 = pnand %p904_p8, %p898_p5 }
  0xa8   :  { %908 = shalt.err (!%p905_p9)  }
  0xa9   :  { %158 = dma.hbm_to_vmem [thread:$0]  %s145_s26, 16, %s1299_s7, [#allocation3 + $0x6] }
  0xaa   :  { %s162_s12 = scalar_lea.hbm %s1463_s1, %s633_s29  ;;  %s1176_s13 = smov [#allocation2 + $0xb]  }
  0xab   :  { %s172_s14 = sshll.u32 %s1176_s13, 4  ;;  %s634_s15 = sld [smem:[#allocation5 + $0x200]]  ;;  %s173_s14 = int_to_ptr.vmem [resolvable:$true] %s172_s14 }
  0xac   :  { %s909_s5 = scalar_lea.hbm %s162_s12, 16  ;;  %p912_p11 = scmp.lt.s32.totalorder %s162_s12, %s1463_s1 }
  0xad   :  { %p910_p10 = scmp.ne.s32.totalorder %s162_s12, %s909_s5  ;;  %p913_p12 = scmp.lt.s32.totalorder %s1238_s19, %s909_s5 }
  0xaf   :  { %p914_p13 = por %p913_p12, %p912_p11 }
  0xb1   :  { %p915_p0 = pnand %p914_p13, %p910_p10 }
  0xb3   :  { %918 = shalt.err (!%p915_p0)  }
  0xb4   :  { %s919_s17 = scalar_lea.vmem %s173_s14, 16  ;;  %p924_p2 = scmp.lt.s32.totalorder %s173_s14, %s1217_s28 }
  0xb5   :  { %p920_p1 = scmp.ne.s32.totalorder %s173_s14, %s919_s17  ;;  %p925_p3 = scmp.lt.s32.totalorder %s1247_s0, %s919_s17 }
  0xb7   :  { %p926_p4 = por %p925_p3, %p924_p2 }
  0xb9   :  { %p927_p5 = pnand %p926_p4, %p920_p1 }
  0xbb   :  { %930 = shalt.err (!%p927_p5)  }
  0xbc   :  { %175 = dma.hbm_to_vmem [thread:$0]  %s162_s12, 16, %s173_s14, [#allocation3 + $0x7] }
  0xbd   :  { %s1177_s7 = smov [#allocation2 + $0x4]   ;;  %s636_s20 = sld [smem:[#allocation5 + $0x201]] }
  0xbe   :  { %s190_s18 = sshll.u32 %s1177_s7, 4  ;;  %s1178_s21 = smov [#allocation2 + $0xc]   ;;  %s191_s18 = int_to_ptr.vmem [resolvable:$true] %s190_s18 }
  0xbf   :  { %s207_s22 = sshll.u32 %s1178_s21, 4  ;;  %s1348_s8 = sld [smem:[#allocation5 + $0x280]]  ;;  %s1350_s22 = int_to_ptr.vmem [resolvable:$true] %s207_s22 }
  0xc0   :  { %s635_s23 = sshll.u32 %s634_s15, 4 }
  0xc1   :  { %s180_s26 = scalar_lea.hbm %s1463_s1, %s635_s23 }
  0xc2   :  { %s931_s29 = scalar_lea.hbm %s180_s26, 16  ;;  %p934_p7 = scmp.lt.s32.totalorder %s180_s26, %s1463_s1 }
  0xc3   :  { %p932_p6 = scmp.ne.s32.totalorder %s180_s26, %s931_s29  ;;  %p935_p8 = scmp.lt.s32.totalorder %s1238_s19, %s931_s29 }
  0xc5   :  { %p936_p9 = por %p935_p8, %p934_p7 }
  0xc7   :  { %p937_p10 = pnand %p936_p9, %p932_p6 }
  0xc9   :  { %940 = shalt.err (!%p937_p10)  }
  0xca   :  { %s941_s11 = scalar_lea.vmem %s191_s18, 16  ;;  %p946_p12 = scmp.lt.s32.totalorder %s191_s18, %s1217_s28 }
  0xcb   :  { %p942_p11 = scmp.ne.s32.totalorder %s191_s18, %s941_s11  ;;  %p947_p13 = scmp.lt.s32.totalorder %s1247_s0, %s941_s11 }
  0xcd   :  { %p948_p0 = por %p947_p13, %p946_p12 }
  0xcf   :  { %p949_p1 = pnand %p948_p0, %p942_p11 }
  0xd1   :  { %952 = shalt.err (!%p949_p1)  }
  0xd2   :  { %193 = dma.hbm_to_vmem [thread:$0]  %s180_s26, 16, %s191_s18, [#allocation3 + $0x8] }
  0xd3   :  { %s637_s27 = sshll.u32 %s636_s20, 4  ;;  %s1179_s6 = smov [#allocation2 + $0x5]  }
  0xd4   :  { %s225_s10 = sshll.u32 %s1179_s6, 4  ;;  %s197_s14 = scalar_lea.hbm %s1463_s1, %s637_s27  ;;  %s1364_s10 = int_to_ptr.vmem [resolvable:$true] %s225_s10 }
  0xd5   :  { %s953_s15 = scalar_lea.hbm %s197_s14, 16  ;;  %p956_p3 = scmp.lt.s32.totalorder %s197_s14, %s1463_s1 }
  0xd6   :  { %p954_p2 = scmp.ne.s32.totalorder %s197_s14, %s953_s15  ;;  %p957_p4 = scmp.lt.s32.totalorder %s1238_s19, %s953_s15 }
  0xd8   :  { %p958_p5 = por %p957_p4, %p956_p3 }
  0xda   :  { %p959_p6 = pnand %p958_p5, %p954_p2 }
  0xdc   :  { %962 = shalt.err (!%p959_p6)  }
  0xdd   :  { %s963_s16 = scalar_lea.vmem %s1350_s22, 16  ;;  %p968_p8 = scmp.lt.s32.totalorder %s1350_s22, %s1217_s28 }
  0xde   :  { %p964_p7 = scmp.ne.s32.totalorder %s1350_s22, %s963_s16  ;;  %p969_p9 = scmp.lt.s32.totalorder %s1247_s0, %s963_s16 }
  0xe0   :  { %p970_p10 = por %p969_p9, %p968_p8 }
  0xe2   :  { %p971_p11 = pnand %p970_p10, %p964_p7 }
  0xe4   :  { %974 = shalt.err (!%p971_p11)  }
  0xe5   :  { %210 = dma.hbm_to_vmem [thread:$0]  %s197_s14, 16, %s1350_s22, [#allocation3 + $0x9] }
  0xe6   :  { %s639_s17 = sshll.u32 %s1348_s8, 4  ;;  %s640_s7 = sld [smem:[#allocation5 + $0x281]] }
  0xe7   :  { %s215_s21 = scalar_lea.hbm %s1463_s1, %s639_s17 }
  0xe8   :  { %s975_s23 = scalar_lea.hbm %s215_s21, 16  ;;  %p978_p13 = scmp.lt.s32.totalorder %s215_s21, %s1463_s1 }
  0xe9   :  { %p976_p12 = scmp.ne.s32.totalorder %s215_s21, %s975_s23  ;;  %p979_p0 = scmp.lt.s32.totalorder %s1238_s19, %s975_s23 }
  0xeb   :  { %p980_p1 = por %p979_p0, %p978_p13 }
  0xed   :  { %p981_p2 = pnand %p980_p1, %p976_p12 }
  0xef   :  { %984 = shalt.err (!%p981_p2)  }
  0xf0   :  { %s985_s22 = scalar_lea.vmem %s1364_s10, 16  ;;  %p990_p4 = scmp.lt.s32.totalorder %s1364_s10, %s1217_s28 }
  0xf1   :  { %p986_p3 = scmp.ne.s32.totalorder %s1364_s10, %s985_s22  ;;  %p991_p5 = scmp.lt.s32.totalorder %s1247_s0, %s985_s22 }
  0xf3   :  { %p992_p6 = por %p991_p5, %p990_p4 }
  0xf5   :  { %p993_p7 = pnand %p992_p6, %p986_p3 }
  0xf7   :  { %996 = shalt.err (!%p993_p7)  }
  0xf8   :  { %228 = dma.hbm_to_vmem [thread:$0]  %s215_s21, 16, %s1364_s10, [#allocation3 + $0xa] }
  0xf9   :  { %s1180_s8 = smov [#allocation2 + $0xd]   ;;  %s642_s29 = sld [smem:[#allocation5 + $0x300]] }
  0xfa   :  { %s242_s26 = sshll.u32 %s1180_s8, 4  ;;  %s1181_s30 = smov [#allocation2 + $0x6]   ;;  %s243_s26 = int_to_ptr.vmem [resolvable:$true] %s242_s26 }
  0xfb   :  { %s260_s2 = sshll.u32 %s1181_s30, 4  ;;  %s1390_s11 = sld [smem:[#allocation5 + $0x301]]  ;;  %s1392_s2 = int_to_ptr.vmem [resolvable:$true] %s260_s2 }
  0xfc   :  { %s641_s27 = sshll.u32 %s640_s7, 4 }
  0xfd   :  { %s232_s13 = scalar_lea.hbm %s1463_s1, %s641_s27 }
  0xfe   :  { %s997_s14 = scalar_lea.hbm %s232_s13, 16  ;;  %p1000_p9 = scmp.lt.s32.totalorder %s232_s13, %s1463_s1 }
  0xff   :  { %p998_p8 = scmp.ne.s32.totalorder %s232_s13, %s997_s14  ;;  %p1001_p10 = scmp.lt.s32.totalorder %s1238_s19, %s997_s14 }
 0x101   :  { %p1002_p11 = por %p1001_p10, %p1000_p9 }
 0x103   :  { %p1003_p12 = pnand %p1002_p11, %p998_p8 }
 0x105   :  { %1006 = shalt.err (!%p1003_p12)  }
 0x106   :  { %s1007_s10 = scalar_lea.vmem %s243_s26, 16  ;;  %p1012_p0 = scmp.lt.s32.totalorder %s243_s26, %s1217_s28 }
 0x107   :  { %p1008_p13 = scmp.ne.s32.totalorder %s243_s26, %s1007_s10  ;;  %p1013_p1 = scmp.lt.s32.totalorder %s1247_s0, %s1007_s10 }
 0x109   :  { %p1014_p2 = por %p1013_p1, %p1012_p0 }
 0x10b   :  { %p1015_p3 = pnand %p1014_p2, %p1008_p13 }
 0x10d   :  { %1018 = shalt.err (!%p1015_p3)  }
 0x10e   :  { %245 = dma.hbm_to_vmem [thread:$0]  %s232_s13, 16, %s243_s26, [#allocation3 + $0xb] }
 0x10f   :  { %s643_s9 = sshll.u32 %s642_s29, 4  ;;  %s1182_s16 = smov [#allocation2 + $0xe]  }
 0x110   :  { %s277_s17 = sshll.u32 %s1182_s16, 4  ;;  %s250_s20 = scalar_lea.hbm %s1463_s1, %s643_s9  ;;  %s1406_s17 = int_to_ptr.vmem [resolvable:$true] %s277_s17 }
 0x111   :  { %s1019_s21 = scalar_lea.hbm %s250_s20, 16  ;;  %p1022_p5 = scmp.lt.s32.totalorder %s250_s20, %s1463_s1 }
 0x112   :  { %p1020_p4 = scmp.ne.s32.totalorder %s250_s20, %s1019_s21  ;;  %p1023_p6 = scmp.lt.s32.totalorder %s1238_s19, %s1019_s21 }
 0x114   :  { %p1024_p7 = por %p1023_p6, %p1022_p5 }
 0x116   :  { %p1025_p8 = pnand %p1024_p7, %p1020_p4 }
 0x118   :  { %1028 = shalt.err (!%p1025_p8)  }
 0x119   :  { %s1029_s25 = scalar_lea.vmem %s1392_s2, 16  ;;  %p1034_p10 = scmp.lt.s32.totalorder %s1392_s2, %s1217_s28 }
 0x11a   :  { %p1030_p9 = scmp.ne.s32.totalorder %s1392_s2, %s1029_s25  ;;  %p1035_p11 = scmp.lt.s32.totalorder %s1247_s0, %s1029_s25 }
 0x11c   :  { %p1036_p12 = por %p1035_p11, %p1034_p10 }
 0x11e   :  { %p1037_p13 = pnand %p1036_p12, %p1030_p9 }
 0x120   :  { %1040 = shalt.err (!%p1037_p13)  }
 0x121   :  { %263 = dma.hbm_to_vmem [thread:$0]  %s250_s20, 16, %s1392_s2, [#allocation3 + $0xc] }
 0x122   :  { %s645_s22 = sshll.u32 %s1390_s11, 4  ;;  %s646_s8 = sld [smem:[#allocation5 + $0x380]] }
 0x123   :  { %s267_s30 = scalar_lea.hbm %s1463_s1, %s645_s22 }
 0x124   :  { %s1041_s27 = scalar_lea.hbm %s267_s30, 16  ;;  %p1044_p1 = scmp.lt.s32.totalorder %s267_s30, %s1463_s1 }
 0x125   :  { %p1042_p0 = scmp.ne.s32.totalorder %s267_s30, %s1041_s27  ;;  %p1045_p2 = scmp.lt.s32.totalorder %s1238_s19, %s1041_s27 }
 0x127   :  { %p1046_p3 = por %p1045_p2, %p1044_p1 }
 0x129   :  { %p1047_p4 = pnand %p1046_p3, %p1042_p0 }
 0x12b   :  { %1050 = shalt.err (!%p1047_p4)  }
 0x12c   :  { %s1051_s2 = scalar_lea.vmem %s1406_s17, 16  ;;  %p1056_p6 = scmp.lt.s32.totalorder %s1406_s17, %s1217_s28 }
 0x12d   :  { %p1052_p5 = scmp.ne.s32.totalorder %s1406_s17, %s1051_s2  ;;  %p1057_p7 = scmp.lt.s32.totalorder %s1247_s0, %s1051_s2 }
 0x12f   :  { %p1058_p8 = por %p1057_p7, %p1056_p6 }
 0x131   :  { %p1059_p9 = pnand %p1058_p8, %p1052_p5 }
 0x133   :  { %1062 = shalt.err (!%p1059_p9)  }
 0x134   :  { %280 = dma.hbm_to_vmem [thread:$0]  %s267_s30, 16, %s1406_s17, [#allocation3 + $0xd] }
 0x135   :  { %s1183_s11 = smov [#allocation2 + $0x7]   ;;  %s648_s14 = sld [smem:[#allocation5 + $0x381]] }
 0x136   :  { %s295_s13 = sshll.u32 %s1183_s11, 4  ;;  %s1184_s15 = smov [#allocation2 + $0xf]   ;;  %s296_s13 = int_to_ptr.vmem [resolvable:$true] %s295_s13 }
 0x137   :  { %s312_s5 = sshll.u32 %s1184_s15, 4  ;;  %s647_s10 = sshll.u32 %s646_s8, 4  ;;  %s1435_s5 = int_to_ptr.vmem [resolvable:$true] %s312_s5 }
 0x138   :  { %s285_s7 = scalar_lea.hbm %s1463_s1, %s647_s10 }
 0x139   :  { %s1063_s18 = scalar_lea.hbm %s285_s7, 16  ;;  %p1066_p11 = scmp.lt.s32.totalorder %s285_s7, %s1463_s1 }
 0x13a   :  { %p1064_p10 = scmp.ne.s32.totalorder %s285_s7, %s1063_s18  ;;  %p1067_p12 = scmp.lt.s32.totalorder %s1238_s19, %s1063_s18 }
 0x13c   :  { %p1068_p13 = por %p1067_p12, %p1066_p11 }
 0x13e   :  { %p1069_p0 = pnand %p1068_p13, %p1064_p10 }
 0x140   :  { %1072 = shalt.err (!%p1069_p0)  }
 0x141   :  { %s1073_s17 = scalar_lea.vmem %s296_s13, 16  ;;  %p1078_p2 = scmp.lt.s32.totalorder %s296_s13, %s1217_s28 }
 0x142   :  { %p1074_p1 = scmp.ne.s32.totalorder %s296_s13, %s1073_s17  ;;  %p1079_p3 = scmp.lt.s32.totalorder %s1247_s0, %s1073_s17 }
 0x144   :  { %p1080_p4 = por %p1079_p3, %p1078_p2 }
 0x146   :  { %p1081_p5 = pnand %p1080_p4, %p1074_p1 }
 0x148   :  { %1084 = shalt.err (!%p1081_p5)  }
 0x149   :  { %298 = dma.hbm_to_vmem [thread:$0]  %s285_s7, 16, %s296_s13, [#allocation3 + $0xe] }
 0x14a   :  { %s649_s23 = sshll.u32 %s648_s14, 4 }
 0x14b   :  { %s302_s22 = scalar_lea.hbm %s1463_s1, %s649_s23 }
 0x14c   :  { %s1085_s8 = scalar_lea.hbm %s302_s22, 16  ;;  %p1088_p7 = scmp.lt.s32.totalorder %s302_s22, %s1463_s1 }
 0x14d   :  { %p1086_p6 = scmp.ne.s32.totalorder %s302_s22, %s1085_s8  ;;  %p1089_p8 = scmp.lt.s32.totalorder %s1238_s19, %s1085_s8 }
 0x14f   :  { %p1090_p9 = por %p1089_p8, %p1088_p7 }
 0x151   :  { %p1091_p10 = pnand %p1090_p9, %p1086_p6 }
 0x153   :  { %1094 = shalt.err (!%p1091_p10)  }
 0x154   :  { %s1095_s30 = scalar_lea.vmem %s1435_s5, 16  ;;  %p1100_p12 = scmp.lt.s32.totalorder %s1435_s5, %s1217_s28 }
 0x155   :  { %p1096_p11 = scmp.ne.s32.totalorder %s1435_s5, %s1095_s30  ;;  %p1101_p13 = scmp.lt.s32.totalorder %s1247_s0, %s1095_s30 }
 0x157   :  { %p1102_p0 = por %p1101_p13, %p1100_p12 }
 0x159   :  { %p1103_p1 = pnand %p1102_p0, %p1096_p11 }
 0x15b   :  { %1106 = shalt.err (!%p1103_p1)  }
 0x15c   :  { %315 = dma.hbm_to_vmem [thread:$0]  %s302_s22, 16, %s1435_s5, [#allocation3 + $0xf] }
 0x15d   :  { %1131 = dma.done.wait [#allocation3], 16 }
 0x15e   :  { %1132 = vsyncadd [#allocation3], 4294967280 }
 0x15f   :  { %1133 = dma.done.wait [#allocation3 + $0x1], 16 }
 0x160   :  { %1134 = vsyncadd [#allocation3 + $0x1], 4294967280 }
 0x161   :  { %1135 = dma.done.wait [#allocation3 + $0x2], 16 }
 0x162   :  { %1136 = vsyncadd [#allocation3 + $0x2], 4294967280 }
 0x163   :  { %1137 = dma.done.wait [#allocation3 + $0x3], 16 }
 0x164   :  { %1138 = vsyncadd [#allocation3 + $0x3], 4294967280 }
 0x165   :  { %1139 = dma.done.wait [#allocation3 + $0x4], 16 }
 0x166   :  { %1140 = vsyncadd [#allocation3 + $0x4], 4294967280 }
 0x167   :  { %1141 = dma.done.wait [#allocation3 + $0x5], 16 }
 0x168   :  { %1142 = vsyncadd [#allocation3 + $0x5], 4294967280 }
 0x169   :  { %1143 = dma.done.wait [#allocation3 + $0x6], 16 }
 0x16a   :  { %1144 = vsyncadd [#allocation3 + $0x6], 4294967280 }
 0x16b   :  { %1145 = dma.done.wait [#allocation3 + $0x7], 16 }
 0x16c   :  { %1146 = vsyncadd [#allocation3 + $0x7], 4294967280 }
 0x16d   :  { %1147 = dma.done.wait [#allocation3 + $0x8], 16 }
 0x16e   :  { %1148 = vsyncadd [#allocation3 + $0x8], 4294967280 }
 0x16f   :  { %1149 = dma.done.wait [#allocation3 + $0x9], 16 }
 0x170   :  { %1150 = vsyncadd [#allocation3 + $0x9], 4294967280 }
 0x171   :  { %1151 = dma.done.wait [#allocation3 + $0xa], 16 }
 0x172   :  { %1152 = vsyncadd [#allocation3 + $0xa], 4294967280 }
 0x173   :  { %1153 = dma.done.wait [#allocation3 + $0xb], 16 }
 0x174   :  { %1154 = vsyncadd [#allocation3 + $0xb], 4294967280 }
 0x175   :  { %1155 = dma.done.wait [#allocation3 + $0xc], 16 }
 0x176   :  { %1156 = vsyncadd [#allocation3 + $0xc], 4294967280 }
 0x177   :  { %1157 = dma.done.wait [#allocation3 + $0xd], 16 }
 0x178   :  { %1158 = vsyncadd [#allocation3 + $0xd], 4294967280 }
 0x179   :  { %1159 = dma.done.wait [#allocation3 + $0xe], 16 }
 0x17a   :  { %1160 = vsyncadd [#allocation3 + $0xe], 4294967280 }
 0x17b   :  { %1161 = dma.done.wait [#allocation3 + $0xf], 16 }
 0x17c   :  { %1162 = vsyncadd [#allocation3 + $0xf], 4294967280  ;;  %v382_v0 = vld [vmem:[#allocation6 + $0xf8] sm:$0xff]  ;;  %v381_v2 = vld [vmem:[#allocation6 + $0xf0] sm:$0xff]  ;;  %s1185_s19 = smov [#allocation9]  }
 0x17d   :  { %v366_v1 = vld [vmem:[#allocation6 + $0x78] sm:$0xff]  ;;  %667 = vmatprep.subr.mxu0 %v382_v0  ;;  %v365_v3 = vld [vmem:[#allocation6 + $0x70] sm:$0xff]  ;;  %v380_v4 = vld [vmem:[#allocation6 + $0xe8] sm:$0xff]  ;;  %s467_s0 = sshll.u32 %s1185_s19, 4  ;;  %s468_s0 = int_to_ptr.vmem [resolvable:$true] %s467_s0 }
 0x17e   :  { %668 = vmatpush3.msra.mxu0 %v366_v1  ;;  %v364_v5 = vld [vmem:[#allocation6 + $0x68] sm:$0xff]  ;;  %v379_v6 = vld [vmem:[#allocation6 + $0xe0] sm:$0xff]  ;;  %v378_v8 = vld [vmem:[#allocation6 + $0xd8] sm:$0xff]  ;;  %s1107_s27 = scalar_lea.vmem %s468_s0, 128  ;;  %p1112_p3 = scmp.lt.s32.totalorder %s468_s0, %s468_s0 }
 0x17f   :  { %669 = vmatprep.subr.mxu0 %v381_v2  ;;  %v363_v7 = vld [vmem:[#allocation6 + $0x60] sm:$0xff]  ;;  %v362_v9 = vld [vmem:[#allocation6 + $0x58] sm:$0xff]  ;;  %v377_v10 = vld [vmem:[#allocation6 + $0xd0] sm:$0xff]  ;;  %p1108_p2 = scmp.ne.s32.totalorder %s468_s0, %s1107_s27  ;;  %p1113_p4 = scmp.lt.s32.totalorder %s1107_s27, %s1107_s27 }
 0x180   :  { %670 = vmatpush3.msra.mxu0 %v365_v3  ;;  %v361_v11 = vld [vmem:[#allocation6 + $0x50] sm:$0xff]  ;;  %v376_v12 = vld [vmem:[#allocation6 + $0xc8] sm:$0xff]  ;;  %v350_v13 = vld [vmem:[#allocation2 + $0x8] sm:$0xff] }
 0x181   :  { %671 = vmatprep.subr.mxu0 %v380_v4  ;;  %v360_v14 = vld [vmem:[#allocation6 + $0x48] sm:$0xff]  ;;  %454 = vmatprep.mubr.f32.mxu0 %v350_v13  ;;  %v375_v15 = vld [vmem:[#allocation6 + $0xc0] sm:$0xff]  ;;  %v374_v17 = vld [vmem:[#allocation6 + $0xb8] sm:$0xff]  ;;  %p1114_p5 = por %p1113_p4, %p1112_p3 }
 0x182   :  { %672 = vmatpush3.msra.mxu0 %v364_v5  ;;  %v359_v16 = vld [vmem:[#allocation6 + $0x40] sm:$0xff]  ;;  %v358_v18 = vld [vmem:[#allocation6 + $0x38] sm:$0xff]  ;;  %v373_v19 = vld [vmem:[#allocation6 + $0xb0] sm:$0xff] }
 0x183   :  { %673 = vmatprep.subr.mxu0 %v379_v6  ;;  %v357_v20 = vld [vmem:[#allocation6 + $0x30] sm:$0xff]  ;;  %v372_v21 = vld [vmem:[#allocation6 + $0xa8] sm:$0xff]  ;;  %v371_v23 = vld [vmem:[#allocation6 + $0xa0] sm:$0xff]  ;;  %p1115_p6 = pnand %p1114_p5, %p1108_p2 }
 0x184   :  { %674 = vmatpush3.msra.mxu0 %v363_v7  ;;  %v356_v22 = vld [vmem:[#allocation6 + $0x28] sm:$0xff]  ;;  %v355_v24 = vld [vmem:[#allocation6 + $0x20] sm:$0xff]  ;;  %v370_v25 = vld [vmem:[#allocation6 + $0x98] sm:$0xff] }
 0x185   :  { %675 = vmatprep.subr.mxu0 %v378_v8  ;;  %v354_v26 = vld [vmem:[#allocation6 + $0x18] sm:$0xff]  ;;  %v369_v27 = vld [vmem:[#allocation6 + $0x90] sm:$0xff]  ;;  %v368_v29 = vld [vmem:[#allocation6 + $0x88] sm:$0xff] }
 0x186   :  { %676 = vmatpush3.msra.mxu0 %v362_v9  ;;  %v353_v28 = vld [vmem:[#allocation6 + $0x10] sm:$0xff]  ;;  %v352_v30 = vld [vmem:[#allocation6 + $0x8] sm:$0xff]  ;;  %v367_v31 = vld [vmem:[#allocation6 + $0x80] sm:$0xff] }
 0x187   :  { %677 = vmatprep.subr.mxu0 %v377_v10  ;;  %v351_v32 = vld [vmem:[#allocation6] sm:$0xff]  ;;  %v349_v33 = vld [vmem:[#allocation2] sm:$0xff] }
 0x188   :  { %678 = vmatpush3.msra.mxu0 %v361_v11  ;;  %v650_v35 = vld [vmem:[%s1465_s3] ss:$0 sm:$0xff] }
 0x189   :  { %679 = vmatprep.subr.mxu0 %v376_v12 }
 0x18a   :  { %680 = vmatpush3.msra.mxu0 %v360_v14 }
 0x18b   :  { %681 = vmatprep.subr.mxu0 %v375_v15 }
 0x18c   :  { %682 = vmatpush3.msra.mxu0 %v359_v16 }
 0x18d   :  { %683 = vmatprep.subr.mxu0 %v374_v17 }
 0x18e   :  { %684 = vmatpush3.msra.mxu0 %v358_v18 }
 0x18f   :  { %685 = vmatprep.subr.mxu0 %v373_v19 }
 0x190   :  { %686 = vmatpush3.msra.mxu0 %v357_v20 }
 0x191   :  { %687 = vmatprep.subr.mxu0 %v372_v21 }
 0x192   :  { %688 = vmatpush3.msra.mxu0 %v356_v22 }
 0x193   :  { %689 = vmatprep.subr.mxu0 %v371_v23 }
 0x194   :  { %690 = vmatpush3.msra.mxu0 %v355_v24 }
 0x195   :  { %691 = vmatprep.subr.mxu0 %v370_v25 }
 0x196   :  { %692 = vmatpush3.msra.mxu0 %v354_v26 }
 0x197   :  { %693 = vmatprep.subr.mxu0 %v369_v27 }
 0x198   :  { %694 = vmatpush3.msra.mxu0 %v353_v28 }
 0x199   :  { %695 = vmatprep.subr.mxu0 %v368_v29 }
 0x19a   :  { %696 = vmatpush3.msra.mxu0 %v352_v30 }
 0x19b   :  { %697 = vmatprep.subr.mxu0 %v367_v31 }
 0x19c   :  { %698 = vmatpush3.msra.mxu0 %v351_v32 }
 0x19d   :  { %455 = vmatmul.mubr.f32.vlgmr.msra.gmra.mxu0 %v349_v33 }
 0x25d   :  { %v699_v34 = vpop.f32.mrf.mxu0 }
 0x25f   :  { %v700_v36 = vpop.f32.mrf.mxu0 }
 0x260   :  { %v701_v37 = vadd.f32 %v700_v36, %v699_v34 }
 0x262   :  { %v457_v38 = vadd.f32 %v701_v37, %v650_v35 }
 0x264   :  { %460 = vst [vmem:[#allocation9] sm:$0xff] %v457_v38 }
 0x265   :  { %1118 = shalt.err (!%p1115_p6)
}
 0x266   :  { %470 = dma.vmem_to_hbm [thread:$0]  %s468_s0, 128, %s1466_s4, [#allocation8]  }
 0x267   :  { %1163 = dma.done.wait [#allocation8], 128  }
 0x268   :  { %1164 = vsyncadd [#allocation8], 4294967168 }
 0x269   :  { %474 = vsyncpa [#allocation7], 1 }
 0x26a   :  { %475 = vsyncpa [#allocation8], 1 }
 0x26b   :  { %476 = vsyncmov [#allocation3] }
 0x26e   :  { %s477_s3 = vpop.sfrf %476 }
 0x26f   :  { %p651_p7 = scmp.ne.s32.totalorder %s477_s3, 0 }
 0x271   :  { %481 = shalt.err (%p651_p7)  }
 0x272   :  { %483 = vsyncmov [#allocation3 + $0x1] }
 0x275   :  { %s484_s2 = vpop.sfrf %483 }
 0x276   :  { %p652_p8 = scmp.ne.s32.totalorder %s484_s2, 0 }
 0x278   :  { %488 = shalt.err (%p652_p8)  }
 0x279   :  { %490 = vsyncmov [#allocation3 + $0x2] }
 0x27c   :  { %s491_s11 = vpop.sfrf %490 }
 0x27d   :  { %p653_p9 = scmp.ne.s32.totalorder %s491_s11, 0 }
 0x27f   :  { %495 = shalt.err (%p653_p9)  }
 0x280   :  { %497 = vsyncmov [#allocation3 + $0x3] }
 0x283   :  { %s498_s13 = vpop.sfrf %497 }
 0x284   :  { %p654_p10 = scmp.ne.s32.totalorder %s498_s13, 0 }
 0x286   :  { %502 = shalt.err (%p654_p10)  }
 0x287   :  { %504 = vsyncmov [#allocation3 + $0x4] }
 0x28a   :  { %s505_s4 = vpop.sfrf %504 }
 0x28b   :  { %p655_p11 = scmp.ne.s32.totalorder %s505_s4, 0 }
 0x28d   :  { %509 = shalt.err (%p655_p11)  }
 0x28e   :  { %511 = vsyncmov [#allocation3 + $0x5] }
 0x291   :  { %s512_s14 = vpop.sfrf %511 }
 0x292   :  { %p656_p12 = scmp.ne.s32.totalorder %s512_s14, 0 }
 0x294   :  { %516 = shalt.err (%p656_p12)  }
 0x295   :  { %518 = vsyncmov [#allocation3 + $0x6] }
 0x298   :  { %s519_s15 = vpop.sfrf %518 }
 0x299   :  { %p657_p13 = scmp.ne.s32.totalorder %s519_s15, 0 }
 0x29b   :  { %523 = shalt.err (%p657_p13)  }
 0x29c   :  { %525 = vsyncmov [#allocation3 + $0x7] }
 0x29f   :  { %s526_s5 = vpop.sfrf %525 }
 0x2a0   :  { %p658_p0 = scmp.ne.s32.totalorder %s526_s5, 0 }
 0x2a2   :  { %530 = shalt.err (%p658_p0)  }
 0x2a3   :  { %532 = vsyncmov [#allocation3 + $0x8] }
 0x2a6   :  { %s533_s10 = vpop.sfrf %532 }
 0x2a7   :  { %p659_p1 = scmp.ne.s32.totalorder %s533_s10, 0 }
 0x2a9   :  { %537 = shalt.err (%p659_p1)  }
 0x2aa   :  { %539 = vsyncmov [#allocation3 + $0x9] }
 0x2ad   :  { %s540_s9 = vpop.sfrf %539 }
 0x2ae   :  { %p660_p2 = scmp.ne.s32.totalorder %s540_s9, 0 }
 0x2b0   :  { %544 = shalt.err (%p660_p2)  }
 0x2b1   :  { %546 = vsyncmov [#allocation3 + $0xa] }
 0x2b4   :  { %s547_s16 = vpop.sfrf %546 }
 0x2b5   :  { %p661_p3 = scmp.ne.s32.totalorder %s547_s16, 0 }
 0x2b7   :  { %551 = shalt.err (%p661_p3)  }
 0x2b8   :  { %553 = vsyncmov [#allocation3 + $0xb] }
 0x2bb   :  { %s554_s7 = vpop.sfrf %553 }
 0x2bc   :  { %p662_p4 = scmp.ne.s32.totalorder %s554_s7, 0 }
 0x2be   :  { %558 = shalt.err (%p662_p4)  }
 0x2bf   :  { %560 = vsyncmov [#allocation3 + $0xc] }
 0x2c2   :  { %s561_s18 = vpop.sfrf %560 }
 0x2c3   :  { %p663_p5 = scmp.ne.s32.totalorder %s561_s18, 0 }
 0x2c5   :  { %565 = shalt.err (%p663_p5)  }
 0x2c6   :  { %567 = vsyncmov [#allocation3 + $0xd] }
 0x2c9   :  { %s568_s20 = vpop.sfrf %567 }
 0x2ca   :  { %p664_p6 = scmp.ne.s32.totalorder %s568_s20, 0 }
 0x2cc   :  { %572 = shalt.err (%p664_p6)  }
 0x2cd   :  { %574 = vsyncmov [#allocation3 + $0xe] }
 0x2d0   :  { %s575_s21 = vpop.sfrf %574 }
 0x2d1   :  { %p665_p7 = scmp.ne.s32.totalorder %s575_s21, 0 }
 0x2d3   :  { %579 = shalt.err (%p665_p7)  }
 0x2d4   :  { %581 = vsyncmov [#allocation3 + $0xf] }
 0x2d7   :  { %s582_s17 = vpop.sfrf %581 }
 0x2d8   :  { %p666_p8 = scmp.ne.s32.totalorder %s582_s17, 0 }
 0x2da   :  { %586 = shalt.err (%p666_p8)  }

</bundles_post_ra>
